<compile_context>
chip_gen: v5e
topology: v5e:2x2
jax: 0.10.0
libtpu: 0.0.40
codegen_flags: <defaults>
</compile_context>

<pallas_src>
import functools

import numpy as np
import jax
import jax.numpy as jnp
from jax import lax
from jax.experimental import pallas as pl
from jax.experimental.pallas import tpu as pltpu


def _round_up(n, m):
    return ((n + m - 1) // m) * m


def _choose_tile(batch, block_b, min_steps=2):
    """Batch tile: as large as block_b, sublane/chunk aligned, but keep at least
    `min_steps` grid steps (v7x megacore sharding + prefetch overlap)."""
    tb = min(block_b, _round_up(batch, 8))
    tb = _round_up(tb, 128) if tb >= 128 else _round_up(tb, 8)
    while tb > 8 and pl.cdiv(batch, tb) < min_steps:
        nxt = max(8, tb // 2)
        nxt = _round_up(nxt, 128) if nxt >= 128 else _round_up(nxt, 8)
        if nxt >= tb:
            break
        tb = nxt
    return tb


def afm_kernel(lin_ref, emb_ref, w_attn_bd_ref, b_attn_bd_ref, w_proj_bd_ref,
               expand_ref, w_fc_tiled_ref, b_fc_ref, out_ref, *,
               num_fields, row_chunk):
    """Fused AFM forward for one batch tile.

    lin_ref       : (TB, D)        linear term pre-summed over fields (+ bias)
    emb_ref       : (F, TB, D)     interaction embeddings, field-major
    w_attn_bd_ref : (P*D, P*A)     block-diagonal attention weight
    b_attn_bd_ref : (1, P*A)       attention bias tiled P times
    w_proj_bd_ref : (P*A, P)       block-diagonal projection weight (b_proj dropped:
                                   softmax over pairs is shift-invariant)
    expand_ref    : (P, P*D)       0/1 lane-expansion matrix
    w_fc_tiled_ref: (P*D, D)       fc weight (transposed) tiled P times
    b_fc_ref      : (1, D)
    out_ref       : (TB, D)
    """
    F = num_fields
    TB = out_ref.shape[0]
    rc = row_chunk
    nchunks = TB // rc
    pairs = [(i, j) for i in range(F - 1) for j in range(i + 1, F)]

    def process_chunk(r0):
        embs = [emb_ref[f, pl.ds(r0, rc), :] for f in range(F)]
        # 1) pairwise interactions, lane-stacked -> (rc, P*D)
        inner = jnp.concatenate([embs[i] * embs[j] for (i, j) in pairs], axis=-1)
        # 2) attention MLP for ALL pairs in one MXU matmul (block-diag weight)
        h = jnp.dot(inner, w_attn_bd_ref[...],
                    preferred_element_type=jnp.float32) + b_attn_bd_ref[...]
        h = jnp.maximum(h, 0.0)                                     # (rc, P*A)
        s = jnp.dot(h, w_proj_bd_ref[...],
                    preferred_element_type=jnp.float32)             # (rc, P)
        # 3) softmax over the pair axis: one lane-dense max/exp/sum + EUP rcp
        m = jnp.max(s, axis=-1, keepdims=True)
        e = jnp.exp(s - m)
        inv = pl.reciprocal(jnp.sum(e, axis=-1, keepdims=True), approx=True)
        attn = e * inv                                              # (rc, P)
        # TODO(synk): F.dropout on attn weights / attn_output omitted (p=0 ->
        #             identity); nonzero dropout would need pltpu.prng_* here.
        # 4) lane-expand attn weights via MXU, then weighted pair-sum + fc are
        #    folded into ONE matmul against the P-times-tiled fc weight.
        attn_exp = jnp.dot(attn, expand_ref[...],
                           preferred_element_type=jnp.float32)      # (rc, P*D)
        fc = jnp.dot(attn_exp * inner, w_fc_tiled_ref[...],
                     preferred_element_type=jnp.float32) + b_fc_ref[...]
        # 5) add pre-summed linear term
        out_ref[pl.ds(r0, rc), :] = (lin_ref[pl.ds(r0, rc), :] + fc
                                     ).astype(out_ref.dtype)

    if nchunks == 1:
        process_chunk(0)
    else:
        def body(c, carry):
            process_chunk(pl.multiple_of(c * rc, rc))
            return carry
        lax.fori_loop(0, nchunks, body, 0)


def afm_forward(x, params, feature_fields, *, block_b=512):
    offsets = jnp.asarray(
        np.concatenate(([0], np.cumsum(feature_fields)[:-1])).astype(np.int32))
    idx = x + offsets[None, :]                                      # (B, F)

    B, F = idx.shape
    D = params["emb_table"].shape[1]
    A = params["w_attn"].shape[0]
    P = F * (F - 1) // 2

    # Linear term pre-summed over fields (+ global bias) -> (B, D).
    lin_sum = (jnp.sum(jnp.take(params["lin_table"], idx, axis=0), axis=1)
               + params["bias"].reshape(1, 1))
    # Gather interaction embeddings field-major directly (no extra transpose).
    emb_t = jnp.take(params["emb_table"], idx.T, axis=0)            # (F, B, D)

    TB = _choose_tile(B, block_b)
    Bp = _round_up(B, TB)
    if Bp != B:
        pad = Bp - B
        lin_sum = jnp.pad(lin_sum, ((0, pad), (0, 0)))
        emb_t = jnp.pad(emb_t, ((0, 0), (0, pad), (0, 0)))
    rc = TB if TB <= 128 else 128                                   # row chunk

    # Block-diagonal / tiled weights (the same MLP is applied to every pair,
    # so all blocks are identical -> pair ordering cannot mismatch).
    eye_p = jnp.eye(P, dtype=jnp.float32)
    w_attn_bd = jnp.kron(eye_p, params["w_attn"].T)                 # (P*D, P*A)
    b_attn_bd = jnp.tile(params["b_attn"].reshape(1, A), (1, P))    # (1, P*A)
    w_proj_bd = jnp.kron(eye_p, params["w_proj"].reshape(A, 1))     # (P*A, P)
    expand = jnp.kron(eye_p, jnp.ones((1, D), jnp.float32))         # (P, P*D)
    w_fc_tiled = jnp.tile(params["w_fc"].T, (P, 1))                 # (P*D, D)
    b_fc = params["b_fc"].reshape(1, D)
    # b_proj intentionally dropped: adding the same scalar to every pair's score
    # does not change the softmax over the pair axis.

    kernel = functools.partial(afm_kernel, num_fields=F, row_chunk=rc)
    out = pl.pallas_call(
        kernel,
        out_shape=jax.ShapeDtypeStruct((Bp, D), jnp.float32),
        grid=(Bp // TB,),
        in_specs=[
            pl.BlockSpec((TB, D), lambda b: (b, 0)),                # lin_sum
            pl.BlockSpec((F, TB, D), lambda b: (0, b, 0)),          # emb field-major
            pl.BlockSpec((P * D, P * A), lambda b: (0, 0)),         # w_attn_bd
            pl.BlockSpec((1, P * A), lambda b: (0, 0)),             # b_attn_bd
            pl.BlockSpec((P * A, P), lambda b: (0, 0)),             # w_proj_bd
            pl.BlockSpec((P, P * D), lambda b: (0, 0)),             # expand
            pl.BlockSpec((P * D, D), lambda b: (0, 0)),             # w_fc_tiled
            pl.BlockSpec((1, D), lambda b: (0, 0)),                 # b_fc
        ],
        out_specs=pl.BlockSpec((TB, D), lambda b: (b, 0)),
        compiler_params=pltpu.CompilerParams(
            dimension_semantics=("parallel",)),
    )(lin_sum, emb_t, w_attn_bd, b_attn_bd, w_proj_bd, expand, w_fc_tiled, b_fc)
    return out[:B]


def afm_reference(x, params, feature_fields):
    """Pure-JAX reference mirroring the PyTorch forward (dropout p=0)."""
    offsets = jnp.asarray(
        np.concatenate(([0], np.cumsum(feature_fields)[:-1])).astype(np.int32))
    idx = x + offsets[None, :]
    lin_emb = params["lin_table"][idx]
    e = params["emb_table"][idx]
    F = e.shape[1]
    row = [i for i in range(F - 1) for _ in range(i + 1, F)]
    col = [j for i in range(F - 1) for j in range(i + 1, F)]
    p, q = e[:, row], e[:, col]
    inner = p * q
    a = jax.nn.relu(inner @ params["w_attn"].T + params["b_attn"])
    s = a @ params["w_proj"].T + params["b_proj"]                   # (B, P, 1)
    s = jax.nn.softmax(s, axis=1)
    attn_out = jnp.sum(s * inner, axis=1)
    fc = attn_out @ params["w_fc"].T + params["b_fc"]
    linear_part = jnp.sum(lin_emb, axis=1) + params["bias"]
    return linear_part + fc


def init_params(key, feature_fields, embed_dim, attn_size):
    V = int(sum(feature_fields)) + 1
    D, A = embed_dim, attn_size
    ks = jax.random.split(key, 8)
    xav = float(np.sqrt(6.0 / (V + D)))
    lin_scale = float(1.0 / np.sqrt(D))
    att_scale = float(1.0 / np.sqrt(D))
    prj_scale = float(1.0 / np.sqrt(A))
    return {
        "lin_table": jax.random.normal(ks[0], (V, D), jnp.float32),
        "emb_table": jax.random.uniform(ks[1], (V, D), jnp.float32, -xav, xav),
        "w_attn": jax.random.uniform(ks[2], (A, D), jnp.float32, -att_scale, att_scale),
        "b_attn": jax.random.uniform(ks[3], (A,), jnp.float32, -att_scale, att_scale),
        "w_proj": jax.random.uniform(ks[4], (1, A), jnp.float32, -prj_scale, prj_scale),
        "b_proj": jax.random.uniform(ks[5], (1,), jnp.float32, -prj_scale, prj_scale),
        "w_fc": jax.random.uniform(ks[6], (D, D), jnp.float32, -lin_scale, lin_scale),
        "b_fc": jax.random.uniform(ks[7], (D,), jnp.float32, -lin_scale, lin_scale),
        "bias": jnp.zeros((1,), jnp.float32),
    }


if __name__ == "__main__":
    feature_fields = (5, 7, 3, 11)   # 4 fields -> P = 6 pairs
    B, D, A = 256, 32, 16            # tile chooser -> TB=128, grid of 2 steps
    # dropouts = (0.0, 0.0) -> dropout is the identity (deterministic)

    key = jax.random.PRNGKey(0)
    pkey, xkey = jax.random.split(key)
    params = init_params(pkey, feature_fields, D, A)

    xkeys = jax.random.split(xkey, len(feature_fields))
    x = jnp.stack(
        [jax.random.randint(xkeys[f], (B,), 0, feature_fields[f], jnp.int32)
         for f in range(len(feature_fields))],
        axis=1)                                                     # (B, F) int32

    out = afm_forward(x, params, feature_fields, block_b=512)
    out = jax.block_until_ready(out)

    ref = afm_reference(x, params, feature_fields)
    # Tolerance slightly relaxed vs 1e-4 for the approximate EUP reciprocal in
    # the in-kernel softmax normalization.
    np.testing.assert_allclose(np.asarray(out), np.asarray(ref),
                               rtol=1e-3, atol=1e-3)
    print("KERNEL_OK")
</pallas_src>

<mosaic_0001>
module attributes {stable_mosaic.version = 11 : i64} {
  func.func @afm_kernel(%arg0: i32, %arg1: memref<128x32xf32, #tpu.memory_space<vmem>>, %arg2: memref<4x128x32xf32, #tpu.memory_space<vmem>>, %arg3: memref<192x96xf32, #tpu.memory_space<vmem>>, %arg4: memref<1x96xf32, #tpu.memory_space<vmem>>, %arg5: memref<96x6xf32, #tpu.memory_space<vmem>>, %arg6: memref<6x192xf32, #tpu.memory_space<vmem>>, %arg7: memref<192x32xf32, #tpu.memory_space<vmem>>, %arg8: memref<1x32xf32, #tpu.memory_space<vmem>>, %arg9: memref<128x32xf32, #tpu.memory_space<vmem>>) attributes {dimension_semantics = [#tpu.dimension_semantics<parallel>], iteration_bounds = array<i64: 2>, scalar_prefetch = 0 : i64, scratch_operands = 0 : i64, tpu.core_type = #tpu.core_type<tc>, window_params = [{transform_indices = @transform_0, window_bounds = array<i64: 128, 32>}, {transform_indices = @transform_1, window_bounds = array<i64: 4, 128, 32>}, {pipeline_mode = #tpu.pipeline_mode<synchronous>, transform_indices = @transform_2, window_bounds = array<i64: 192, 96>}, {pipeline_mode = #tpu.pipeline_mode<synchronous>, transform_indices = @transform_3, window_bounds = array<i64: 1, 96>}, {pipeline_mode = #tpu.pipeline_mode<synchronous>, transform_indices = @transform_4, window_bounds = array<i64: 96, 6>}, {pipeline_mode = #tpu.pipeline_mode<synchronous>, transform_indices = @transform_5, window_bounds = array<i64: 6, 192>}, {pipeline_mode = #tpu.pipeline_mode<synchronous>, transform_indices = @transform_6, window_bounds = array<i64: 192, 32>}, {pipeline_mode = #tpu.pipeline_mode<synchronous>, transform_indices = @transform_7, window_bounds = array<i64: 1, 32>}, {transform_indices = @transform_8, window_bounds = array<i64: 128, 32>}]} {
    %c0 = arith.constant 0 : index
    %c0_0 = arith.constant 0 : index
    %c0_1 = arith.constant 0 : index
    %0 = vector.load %arg2[%c0, %c0_0, %c0_1] : memref<4x128x32xf32, #tpu.memory_space<vmem>>, vector<1x128x32xf32>
    %1 = vector.shape_cast %0 : vector<1x128x32xf32> to vector<128x32xf32>
    %c1 = arith.constant 1 : index
    %c0_2 = arith.constant 0 : index
    %c0_3 = arith.constant 0 : index
    %2 = vector.load %arg2[%c1, %c0_2, %c0_3] : memref<4x128x32xf32, #tpu.memory_space<vmem>>, vector<1x128x32xf32>
    %3 = vector.shape_cast %2 : vector<1x128x32xf32> to vector<128x32xf32>
    %c2 = arith.constant 2 : index
    %c0_4 = arith.constant 0 : index
    %c0_5 = arith.constant 0 : index
    %4 = vector.load %arg2[%c2, %c0_4, %c0_5] : memref<4x128x32xf32, #tpu.memory_space<vmem>>, vector<1x128x32xf32>
    %5 = vector.shape_cast %4 : vector<1x128x32xf32> to vector<128x32xf32>
    %c3 = arith.constant 3 : index
    %c0_6 = arith.constant 0 : index
    %c0_7 = arith.constant 0 : index
    %6 = vector.load %arg2[%c3, %c0_6, %c0_7] : memref<4x128x32xf32, #tpu.memory_space<vmem>>, vector<1x128x32xf32>
    %7 = vector.shape_cast %6 : vector<1x128x32xf32> to vector<128x32xf32>
    %8 = arith.mulf %1, %3 : vector<128x32xf32>
    %9 = arith.mulf %1, %5 : vector<128x32xf32>
    %10 = arith.mulf %1, %7 : vector<128x32xf32>
    %11 = arith.mulf %3, %5 : vector<128x32xf32>
    %12 = arith.mulf %3, %7 : vector<128x32xf32>
    %13 = arith.mulf %5, %7 : vector<128x32xf32>
    %14 = tpu.concatenate %8, %9, %10, %11, %12, %13 in 1 : vector<128x32xf32>, vector<128x32xf32>, vector<128x32xf32>, vector<128x32xf32>, vector<128x32xf32>, vector<128x32xf32> -> vector<128x192xf32>
    %c0_8 = arith.constant 0 : index
    %c0_9 = arith.constant 0 : index
    %15 = vector.load %arg3[%c0_8, %c0_9] : memref<192x96xf32, #tpu.memory_space<vmem>>, vector<192x96xf32>
    %cst = arith.constant dense<0.000000e+00> : vector<128x96xf32>
    %16 = tpu.matmul %14, %15, %cst {dimension_numbers = #tpu.dot_dimension_numbers<[1], [0], [0], [1], [0, 0, 1, 1], [], []>} : vector<128x192xf32>, vector<192x96xf32>, vector<128x96xf32> -> vector<128x96xf32>
    %c0_10 = arith.constant 0 : index
    %c0_11 = arith.constant 0 : index
    %17 = vector.load %arg4[%c0_10, %c0_11] : memref<1x96xf32, #tpu.memory_space<vmem>>, vector<1x96xf32>
    %18 = vector.broadcast %17 : vector<1x96xf32> to vector<128x96xf32>
    %19 = arith.addf %16, %18 : vector<128x96xf32>
    %cst_12 = arith.constant 0.000000e+00 : f32
    %20 = vector.broadcast %cst_12 : f32 to vector<128x96xf32>
    %21 = arith.maximumf %19, %20 : vector<128x96xf32>
    %c0_13 = arith.constant 0 : index
    %c0_14 = arith.constant 0 : index
    %22 = vector.load %arg5[%c0_13, %c0_14] : memref<96x6xf32, #tpu.memory_space<vmem>>, vector<96x6xf32>
    %cst_15 = arith.constant dense<0.000000e+00> : vector<128x6xf32>
    %23 = tpu.matmul %21, %22, %cst_15 {dimension_numbers = #tpu.dot_dimension_numbers<[1], [0], [0], [1], [0, 0, 1, 1], [], []>} : vector<128x96xf32>, vector<96x6xf32>, vector<128x6xf32> -> vector<128x6xf32>
    %cst_16 = arith.constant dense<0xFF800000> : vector<128xf32>
    %24 = vector.multi_reduction <maximumf>, %23, %cst_16 [1] : vector<128x6xf32> to vector<128xf32>
    %25 = vector.shape_cast %24 : vector<128xf32> to vector<128x1xf32>
    %26 = vector.broadcast %25 : vector<128x1xf32> to vector<128x6xf32>
    %27 = arith.subf %23, %26 : vector<128x6xf32>
    %28 = math.exp %27 : vector<128x6xf32>
    %cst_17 = arith.constant dense<0.000000e+00> : vector<128xf32>
    %29 = vector.multi_reduction <add>, %28, %cst_17 [1] : vector<128x6xf32> to vector<128xf32>
    %30 = vector.shape_cast %29 : vector<128xf32> to vector<128x1xf32>
    %31 = tpu.reciprocal %30 {approx = true} : vector<128x1xf32> -> vector<128x1xf32>
    %32 = vector.broadcast %31 : vector<128x1xf32> to vector<128x6xf32>
    %33 = arith.mulf %28, %32 : vector<128x6xf32>
    %c0_18 = arith.constant 0 : index
    %c0_19 = arith.constant 0 : index
    %34 = vector.load %arg6[%c0_18, %c0_19] : memref<6x192xf32, #tpu.memory_space<vmem>>, vector<6x192xf32>
    %cst_20 = arith.constant dense<0.000000e+00> : vector<128x192xf32>
    %35 = tpu.matmul %33, %34, %cst_20 {dimension_numbers = #tpu.dot_dimension_numbers<[1], [0], [0], [1], [0, 0, 1, 1], [], []>} : vector<128x6xf32>, vector<6x192xf32>, vector<128x192xf32> -> vector<128x192xf32>
    %36 = arith.mulf %35, %14 : vector<128x192xf32>
    %c0_21 = arith.constant 0 : index
    %c0_22 = arith.constant 0 : index
    %37 = vector.load %arg7[%c0_21, %c0_22] : memref<192x32xf32, #tpu.memory_space<vmem>>, vector<192x32xf32>
    %cst_23 = arith.constant dense<0.000000e+00> : vector<128x32xf32>
    %38 = tpu.matmul %36, %37, %cst_23 {dimension_numbers = #tpu.dot_dimension_numbers<[1], [0], [0], [1], [0, 0, 1, 1], [], []>} : vector<128x192xf32>, vector<192x32xf32>, vector<128x32xf32> -> vector<128x32xf32>
    %c0_24 = arith.constant 0 : index
    %c0_25 = arith.constant 0 : index
    %39 = vector.load %arg8[%c0_24, %c0_25] : memref<1x32xf32, #tpu.memory_space<vmem>>, vector<1x32xf32>
    %40 = vector.broadcast %39 : vector<1x32xf32> to vector<128x32xf32>
    %41 = arith.addf %38, %40 : vector<128x32xf32>
    %c0_26 = arith.constant 0 : index
    %c0_27 = arith.constant 0 : index
    %42 = vector.load %arg1[%c0_26, %c0_27] : memref<128x32xf32, #tpu.memory_space<vmem>>, vector<128x32xf32>
    %43 = arith.addf %42, %41 : vector<128x32xf32>
    %c0_28 = arith.constant 0 : index
    %c0_29 = arith.constant 0 : index
    %44 = vector.load %arg9[%c0_28, %c0_29] : memref<128x32xf32, #tpu.memory_space<vmem>>, vector<128x32xf32>
    tpu.vector_store %arg9[%c0_28, %c0_29], %43 {strides = array<i32>} : memref<128x32xf32, #tpu.memory_space<vmem>>, vector<128x32xf32>,
    return
  }
  func.func @transform_0(%arg0: i32) -> (i32, i32) {
    %c0_i32 = arith.constant 0 : i32
    %c0_i32_0 = arith.constant 0 : i32
    return %arg0, %c0_i32 : i32, i32
  }
  func.func @transform_1(%arg0: i32) -> (i32, i32, i32) {
    %c0_i32 = arith.constant 0 : i32
    %c0_i32_0 = arith.constant 0 : i32
    %c0_i32_1 = arith.constant 0 : i32
    return %c0_i32, %arg0, %c0_i32_0 : i32, i32, i32
  }
  func.func @transform_2(%arg0: i32) -> (i32, i32) {
    %c0_i32 = arith.constant 0 : i32
    %c0_i32_0 = arith.constant 0 : i32
    %c0_i32_1 = arith.constant 0 : i32
    return %c0_i32, %c0_i32_0 : i32, i32
  }
  func.func @transform_3(%arg0: i32) -> (i32, i32) {
    %c0_i32 = arith.constant 0 : i32
    %c0_i32_0 = arith.constant 0 : i32
    %c0_i32_1 = arith.constant 0 : i32
    return %c0_i32, %c0_i32_0 : i32, i32
  }
  func.func @transform_4(%arg0: i32) -> (i32, i32) {
    %c0_i32 = arith.constant 0 : i32
    %c0_i32_0 = arith.constant 0 : i32
    %c0_i32_1 = arith.constant 0 : i32
    return %c0_i32, %c0_i32_0 : i32, i32
  }
  func.func @transform_5(%arg0: i32) -> (i32, i32) {
    %c0_i32 = arith.constant 0 : i32
    %c0_i32_0 = arith.constant 0 : i32
    %c0_i32_1 = arith.constant 0 : i32
    return %c0_i32, %c0_i32_0 : i32, i32
  }
  func.func @transform_6(%arg0: i32) -> (i32, i32) {
    %c0_i32 = arith.constant 0 : i32
    %c0_i32_0 = arith.constant 0 : i32
    %c0_i32_1 = arith.constant 0 : i32
    return %c0_i32, %c0_i32_0 : i32, i32
  }
  func.func @transform_7(%arg0: i32) -> (i32, i32) {
    %c0_i32 = arith.constant 0 : i32
    %c0_i32_0 = arith.constant 0 : i32
    %c0_i32_1 = arith.constant 0 : i32
    return %c0_i32, %c0_i32_0 : i32, i32
  }
  func.func @transform_8(%arg0: i32) -> (i32, i32) {
    %c0_i32 = arith.constant 0 : i32
    %c0_i32_0 = arith.constant 0 : i32
    return %arg0, %c0_i32 : i32, i32
  }
}

</mosaic_0001>

<bundles_post_ra>
// kernel: tpu_custom_call.1
= control target key start
LH: loop header
LB: loop body
LE: loop exit
PB: predicated region body
PF: predicated region fallthrough
CT: control target
= control target key end

     0   :  { %s2507_s27 = smov 0   ;;  %s2509_s28 = smov 0   ;;  %s3957_s0 = inlined_call_operand.vmem [shape: f32[256,32], index: 0, kind: input, shape index: {}]   ;;  %s3958_s1 = inlined_call_operand.vmem [shape: f32[4,256,32], index: 1, kind: input, shape index: {}]   ;;  %s3959_s2 = inlined_call_operand.vmem [shape: f32[192,96], index: 2, kind: input, shape index: {}]   ;;  %s3960_s3 = inlined_call_operand.vmem [shape: f32[1,96], index: 3, kind: input, shape index: {}]   ;;  %s3961_s4 = inlined_call_operand.vmem [shape: f32[96,6], index: 4, kind: input, shape index: {}]   ;;  %s3962_s5 = inlined_call_operand.vmem [shape: f32[6,192], index: 5, kind: input, shape index: {}]   ;;  %s3963_s6 = inlined_call_operand.vmem [shape: f32[192,32], index: 6, kind: input, shape index: {}]   ;;  %s3964_s7 = inlined_call_operand.vmem [shape: f32[1,32], index: 7, kind: input, shape index: {}]   ;;  %s3965_s8 = inlined_call_operand.vmem [shape: f32[256,32], index: 8, kind: output, shape index: {}]  }
   0x1   :  { %s2511_s29 = smov 0  }
   0x2 LB: > { %s2175_s30 = sadd.s32 4294967295, %s2457_s29   ;;  %s2524_s9 = sadd.s32 1, %s2457_s29   ;;  %s2457_s29 = sphi %s2511_s29, %s4021_s29   ;;  %s2453_s28 = sphi %s2509_s28, %s4020_s28   ;;  %s2449_s27 = sphi %s2507_s27, %s4019_s27  }
   0x3   : > { %s48_s10 = ssub.s32 %s2457_s29, %s2524_s9  ;;  %s51_s11 = sadd.s32 1, %s2453_s28 }
   0x4   : > { %p49_p0 = scmp.eq.s32.totalorder %s48_s10, 0  ;;  %p58_p1 = scmp.ne.s32.totalorder %s2453_s28, %s2449_s27 }
   0x5   : > { %p59_p2 = scmp.eq.s32.totalorder %s2457_s29, 0  ;;  %p2178_p4 = scmp.ge.s32.totalorder %s2457_s29, 2 }
   0x6   : > { %s2533_s12 = scalar_select %p49_p0, %s2453_s28, %s51_s11  }
   0x7   : > { %p60_p3 = por %p59_p2, %p58_p1  ;;  %254 = sbr.rel (%p2178_p4) target bundleno = 80 (0x50), region = 40 }
   0xc   : > { %266 = sbr.rel (!%p60_p3) target bundleno = 80 (0x50), region = 48  ;;  %s268_s13 = sand.u32 (%p60_p3), 1, %s2453_s28  }
   0xd   : > { %s2320_s14 = sshll.u32 (%p60_p3), %s2457_s29, 7  ;;  %s2179_s15 = sshll.u32 (%p60_p3), %s268_s13, 9 }
   0xe   : > { %s2541_s18 = scalar_lea.vmem (%p60_p3), %s3958_s1, %s2320_s14  ;;  %s2546_s19 = scalar_lea.vmem (%p60_p3), [#allocation2], %s2179_s15 }
   0xf   : > { %v428_v0 = vld [vmem:[%s2541_s18] sm:$0xff] (%p60_p3)  ;;  %v430_v1 = vld [vmem:[%s2541_s18 + $0x8] sm:$0xff] (%p60_p3)  ;;  %v432_v2 = vld [vmem:[%s2541_s18 + $0x10] sm:$0xff] (%p60_p3) }
  0x10   : > { %429 = vst [vmem:[%s2546_s19] sm:$0xff] (%p60_p3), %v428_v0  ;;  %v434_v3 = vld [vmem:[%s2541_s18 + $0x18] sm:$0xff] (%p60_p3)  ;;  %v436_v4 = vld [vmem:[%s2541_s18 + $0x20] sm:$0xff] (%p60_p3)  ;;  %v438_v5 = vld [vmem:[%s2541_s18 + $0x28] sm:$0xff] (%p60_p3) }
  0x11   : > { %431 = vst [vmem:[%s2546_s19 + $0x8] sm:$0xff] %v430_v1  ;;  %v440_v6 = vld [vmem:[%s2541_s18 + $0x30] sm:$0xff]  ;;  %v442_v7 = vld [vmem:[%s2541_s18 + $0x38] sm:$0xff]  ;;  %v444_v8 = vld [vmem:[%s2541_s18 + $0x40] sm:$0xff] }
  0x12   : > { %433 = vst [vmem:[%s2546_s19 + $0x10] sm:$0xff] %v432_v2  ;;  %v446_v9 = vld [vmem:[%s2541_s18 + $0x48] sm:$0xff]  ;;  %v448_v10 = vld [vmem:[%s2541_s18 + $0x50] sm:$0xff]  ;;  %v450_v11 = vld [vmem:[%s2541_s18 + $0x58] sm:$0xff] }
  0x13   : > { %435 = vst [vmem:[%s2546_s19 + $0x18] sm:$0xff] %v434_v3  ;;  %v452_v12 = vld [vmem:[%s2541_s18 + $0x60] sm:$0xff]  ;;  %v454_v13 = vld [vmem:[%s2541_s18 + $0x68] sm:$0xff]  ;;  %v456_v14 = vld [vmem:[%s2541_s18 + $0x70] sm:$0xff] }
  0x14   : > { %437 = vst [vmem:[%s2546_s19 + $0x20] sm:$0xff] %v436_v4  ;;  %v458_v15 = vld [vmem:[%s2541_s18 + $0x78] sm:$0xff]  ;;  %v460_v16 = vld [vmem:[%s2541_s18 + $0x100] sm:$0xff]  ;;  %v462_v17 = vld [vmem:[%s2541_s18 + $0x108] sm:$0xff] }
  0x15   : > { %439 = vst [vmem:[%s2546_s19 + $0x28] sm:$0xff] %v438_v5  ;;  %v464_v18 = vld [vmem:[%s2541_s18 + $0x110] sm:$0xff]  ;;  %v466_v19 = vld [vmem:[%s2541_s18 + $0x118] sm:$0xff]  ;;  %v468_v20 = vld [vmem:[%s2541_s18 + $0x120] sm:$0xff] }
  0x16   : > { %441 = vst [vmem:[%s2546_s19 + $0x30] sm:$0xff] %v440_v6  ;;  %v470_v21 = vld [vmem:[%s2541_s18 + $0x128] sm:$0xff]  ;;  %v472_v22 = vld [vmem:[%s2541_s18 + $0x130] sm:$0xff]  ;;  %v474_v23 = vld [vmem:[%s2541_s18 + $0x138] sm:$0xff] }
  0x17   : > { %443 = vst [vmem:[%s2546_s19 + $0x38] sm:$0xff] %v442_v7  ;;  %v476_v24 = vld [vmem:[%s2541_s18 + $0x140] sm:$0xff]  ;;  %v478_v25 = vld [vmem:[%s2541_s18 + $0x148] sm:$0xff]  ;;  %v480_v26 = vld [vmem:[%s2541_s18 + $0x150] sm:$0xff] }
  0x18   : > { %445 = vst [vmem:[%s2546_s19 + $0x40] sm:$0xff] %v444_v8  ;;  %v482_v27 = vld [vmem:[%s2541_s18 + $0x158] sm:$0xff]  ;;  %v484_v28 = vld [vmem:[%s2541_s18 + $0x160] sm:$0xff]  ;;  %v486_v29 = vld [vmem:[%s2541_s18 + $0x168] sm:$0xff] }
  0x19   : > { %447 = vst [vmem:[%s2546_s19 + $0x48] sm:$0xff] %v446_v9  ;;  %v488_v30 = vld [vmem:[%s2541_s18 + $0x170] sm:$0xff]  ;;  %v490_v31 = vld [vmem:[%s2541_s18 + $0x178] sm:$0xff]  ;;  %v492_v32 = vld [vmem:[%s2541_s18 + $0x200] sm:$0xff] }
  0x1a   : > { %449 = vst [vmem:[%s2546_s19 + $0x50] sm:$0xff] %v448_v10  ;;  %v494_v33 = vld [vmem:[%s2541_s18 + $0x208] sm:$0xff]  ;;  %v496_v34 = vld [vmem:[%s2541_s18 + $0x210] sm:$0xff]  ;;  %v498_v35 = vld [vmem:[%s2541_s18 + $0x218] sm:$0xff] }
  0x1b   : > { %451 = vst [vmem:[%s2546_s19 + $0x58] sm:$0xff] %v450_v11  ;;  %v500_v36 = vld [vmem:[%s2541_s18 + $0x220] sm:$0xff]  ;;  %v502_v37 = vld [vmem:[%s2541_s18 + $0x228] sm:$0xff]  ;;  %v504_v38 = vld [vmem:[%s2541_s18 + $0x230] sm:$0xff] }
  0x1c   : > { %453 = vst [vmem:[%s2546_s19 + $0x60] sm:$0xff] %v452_v12  ;;  %v506_v39 = vld [vmem:[%s2541_s18 + $0x238] sm:$0xff]  ;;  %v508_v40 = vld [vmem:[%s2541_s18 + $0x240] sm:$0xff]  ;;  %v510_v41 = vld [vmem:[%s2541_s18 + $0x248] sm:$0xff] }
  0x1d   : > { %455 = vst [vmem:[%s2546_s19 + $0x68] sm:$0xff] %v454_v13  ;;  %v512_v42 = vld [vmem:[%s2541_s18 + $0x250] sm:$0xff]  ;;  %v514_v43 = vld [vmem:[%s2541_s18 + $0x258] sm:$0xff]  ;;  %v516_v44 = vld [vmem:[%s2541_s18 + $0x260] sm:$0xff] }
  0x1e   : > { %457 = vst [vmem:[%s2546_s19 + $0x70] sm:$0xff] %v456_v14  ;;  %v518_v45 = vld [vmem:[%s2541_s18 + $0x268] sm:$0xff]  ;;  %v520_v46 = vld [vmem:[%s2541_s18 + $0x270] sm:$0xff]  ;;  %v522_v47 = vld [vmem:[%s2541_s18 + $0x278] sm:$0xff] }
  0x1f   : > { %459 = vst [vmem:[%s2546_s19 + $0x78] sm:$0xff] %v458_v15  ;;  %v524_v48 = vld [vmem:[%s2541_s18 + $0x300] sm:$0xff]  ;;  %v526_v49 = vld [vmem:[%s2541_s18 + $0x308] sm:$0xff]  ;;  %v528_v50 = vld [vmem:[%s2541_s18 + $0x310] sm:$0xff] }
  0x20   : > { %461 = vst [vmem:[%s2546_s19 + $0x80] sm:$0xff] %v460_v16  ;;  %v530_v51 = vld [vmem:[%s2541_s18 + $0x318] sm:$0xff]  ;;  %v532_v52 = vld [vmem:[%s2541_s18 + $0x320] sm:$0xff]  ;;  %v534_v53 = vld [vmem:[%s2541_s18 + $0x328] sm:$0xff] }
  0x21   : > { %463 = vst [vmem:[%s2546_s19 + $0x88] sm:$0xff] %v462_v17  ;;  %v536_v54 = vld [vmem:[%s2541_s18 + $0x330] sm:$0xff]  ;;  %v538_v55 = vld [vmem:[%s2541_s18 + $0x338] sm:$0xff]  ;;  %v540_v56 = vld [vmem:[%s2541_s18 + $0x340] sm:$0xff] }
  0x22   : > { %465 = vst [vmem:[%s2546_s19 + $0x90] sm:$0xff] %v464_v18  ;;  %v542_v57 = vld [vmem:[%s2541_s18 + $0x348] sm:$0xff]  ;;  %v544_v58 = vld [vmem:[%s2541_s18 + $0x350] sm:$0xff]  ;;  %v546_v59 = vld [vmem:[%s2541_s18 + $0x358] sm:$0xff] }
  0x23   : > { %467 = vst [vmem:[%s2546_s19 + $0x98] sm:$0xff] %v466_v19  ;;  %v548_v60 = vld [vmem:[%s2541_s18 + $0x360] sm:$0xff]  ;;  %v550_v61 = vld [vmem:[%s2541_s18 + $0x368] sm:$0xff]  ;;  %v552_v62 = vld [vmem:[%s2541_s18 + $0x370] sm:$0xff] }
  0x24   : > { %469 = vst [vmem:[%s2546_s19 + $0xa0] sm:$0xff] %v468_v20  ;;  %v554_v63 = vld [vmem:[%s2541_s18 + $0x378] sm:$0xff] }
  0x25   : > { %471 = vst [vmem:[%s2546_s19 + $0xa8] sm:$0xff] %v470_v21 }
  0x26   : > { %473 = vst [vmem:[%s2546_s19 + $0xb0] sm:$0xff] %v472_v22 }
  0x27   : > { %475 = vst [vmem:[%s2546_s19 + $0xb8] sm:$0xff] %v474_v23 }
  0x28   : > { %477 = vst [vmem:[%s2546_s19 + $0xc0] sm:$0xff] %v476_v24 }
  0x29   : > { %479 = vst [vmem:[%s2546_s19 + $0xc8] sm:$0xff] %v478_v25 }
  0x2a   : > { %481 = vst [vmem:[%s2546_s19 + $0xd0] sm:$0xff] %v480_v26 }
  0x2b   : > { %483 = vst [vmem:[%s2546_s19 + $0xd8] sm:$0xff] %v482_v27 }
  0x2c   : > { %485 = vst [vmem:[%s2546_s19 + $0xe0] sm:$0xff] %v484_v28 }
  0x2d   : > { %487 = vst [vmem:[%s2546_s19 + $0xe8] sm:$0xff] %v486_v29 }
  0x2e   : > { %489 = vst [vmem:[%s2546_s19 + $0xf0] sm:$0xff] %v488_v30 }
  0x2f   : > { %491 = vst [vmem:[%s2546_s19 + $0xf8] sm:$0xff] %v490_v31 }
  0x30   : > { %493 = vst [vmem:[%s2546_s19 + $0x100] sm:$0xff] %v492_v32 }
  0x31   : > { %495 = vst [vmem:[%s2546_s19 + $0x108] sm:$0xff] %v494_v33 }
  0x32   : > { %497 = vst [vmem:[%s2546_s19 + $0x110] sm:$0xff] %v496_v34 }
  0x33   : > { %499 = vst [vmem:[%s2546_s19 + $0x118] sm:$0xff] %v498_v35 }
  0x34   : > { %501 = vst [vmem:[%s2546_s19 + $0x120] sm:$0xff] %v500_v36 }
  0x35   : > { %503 = vst [vmem:[%s2546_s19 + $0x128] sm:$0xff] %v502_v37 }
  0x36   : > { %505 = vst [vmem:[%s2546_s19 + $0x130] sm:$0xff] %v504_v38 }
  0x37   : > { %507 = vst [vmem:[%s2546_s19 + $0x138] sm:$0xff] %v506_v39 }
  0x38   : > { %509 = vst [vmem:[%s2546_s19 + $0x140] sm:$0xff] %v508_v40 }
  0x39   : > { %511 = vst [vmem:[%s2546_s19 + $0x148] sm:$0xff] %v510_v41 }
  0x3a   : > { %513 = vst [vmem:[%s2546_s19 + $0x150] sm:$0xff] %v512_v42 }
  0x3b   : > { %515 = vst [vmem:[%s2546_s19 + $0x158] sm:$0xff] %v514_v43 }
  0x3c   : > { %517 = vst [vmem:[%s2546_s19 + $0x160] sm:$0xff] %v516_v44 }
  0x3d   : > { %519 = vst [vmem:[%s2546_s19 + $0x168] sm:$0xff] %v518_v45 }
  0x3e   : > { %521 = vst [vmem:[%s2546_s19 + $0x170] sm:$0xff] %v520_v46 }
  0x3f   : > { %523 = vst [vmem:[%s2546_s19 + $0x178] sm:$0xff] %v522_v47 }
  0x40   : > { %525 = vst [vmem:[%s2546_s19 + $0x180] sm:$0xff] %v524_v48 }
  0x41   : > { %527 = vst [vmem:[%s2546_s19 + $0x188] sm:$0xff] %v526_v49 }
  0x42   : > { %529 = vst [vmem:[%s2546_s19 + $0x190] sm:$0xff] %v528_v50 }
  0x43   : > { %531 = vst [vmem:[%s2546_s19 + $0x198] sm:$0xff] %v530_v51 }
  0x44   : > { %533 = vst [vmem:[%s2546_s19 + $0x1a0] sm:$0xff] %v532_v52 }
  0x45   : > { %535 = vst [vmem:[%s2546_s19 + $0x1a8] sm:$0xff] %v534_v53 }
  0x46   : > { %537 = vst [vmem:[%s2546_s19 + $0x1b0] sm:$0xff] %v536_v54 }
  0x47   : > { %539 = vst [vmem:[%s2546_s19 + $0x1b8] sm:$0xff] %v538_v55 }
  0x48   : > { %541 = vst [vmem:[%s2546_s19 + $0x1c0] sm:$0xff] %v540_v56 }
  0x49   : > { %543 = vst [vmem:[%s2546_s19 + $0x1c8] sm:$0xff] %v542_v57 }
  0x4a   : > { %545 = vst [vmem:[%s2546_s19 + $0x1d0] sm:$0xff] %v544_v58 }
  0x4b   : > { %547 = vst [vmem:[%s2546_s19 + $0x1d8] sm:$0xff] %v546_v59 }
  0x4c   : > { %549 = vst [vmem:[%s2546_s19 + $0x1e0] sm:$0xff] %v548_v60 }
  0x4d   : > { %551 = vst [vmem:[%s2546_s19 + $0x1e8] sm:$0xff] %v550_v61 }
  0x4e   : > { %553 = vst [vmem:[%s2546_s19 + $0x1f0] sm:$0xff] %v552_v62 }
  0x4f   : > { %555 = vst [vmem:[%s2546_s19 + $0x1f8] sm:$0xff] %v554_v63 }
  0x50 PF: > { %p2182_p5 = scmp.ge.s32.totalorder %s2457_s29, 1  ;;  %p560_p6 = scmp.lt.s32.totalorder %s2457_s29, 3 }
  0x52   : > { %p561_p7 = pnand %p2182_p5, %p560_p6 }
  0x54   : > { %564 = sbr.rel (%p561_p7) target bundleno = 1451 (0x5ab), region = 86 }
  0x59   : > { %s567_s20 = sand.u32 1, %s2449_s27   ;;  %s2459_s23 = smov 96   ;;  %v1119_v58 = vld [vmem:[%s3959_s2 + $0x78] sm:$0xff]  ;;  %v1118_v59 = vld [vmem:[%s3959_s2 + $0x70] sm:$0xff]  ;;  %vm1037_vm0 = vcmask 261120   ;;  %vm1054_vm1 = vcmask 523264  }
  0x5a   : > { %s2183_s21 = sshll.u32 %s567_s20, 9  ;;  %s2460_s24 = smov 32   ;;  %1180 = vmatpush.msra.mxu0 %v1119_v58  ;;  %v1109_v58 = vld [vmem:[%s3959_s2 + $0x28] sm:$0xff]  ;;  %vm1071_vm2 = vcmask 785408   ;;  %vm1451_vm3 = vcmask 48128   ;;  %vm1678_vm4 = vcmask 1045504  }
  0x5b   : > { %s2676_s22 = scalar_lea.vmem [#allocation2], %s2183_s21  ;;  %s2461_s25 = smov 64  }
  0x5c   : > { %v2679_v0 = vld [vmem:[%s2676_s22 + $0x80] sm:$0xff]  ;;  %v2694_v6 = vld [vmem:[%s2676_s22 + $0x8] sm:$0xff]  ;;  %v2719_v15 = vld [vmem:[%s2676_s22 + $0x190] sm:$0xff]  ;;  %1181 = vmatpush.msra.mxu0 %v1118_v59  ;;  %s2184_s21 = sshll.u32 %s2175_s30, 4 }
  0x5d   : > { %3989 = vst [vmem:[#allocation3_spill] sm:$0xff] %v2679_v0  ;;  %v2682_v1 = vld [vmem:[%s2676_s22 + $0x100] sm:$0xff]  ;;  %v2697_v7 = vld [vmem:[%s2676_s22 + $0x108] sm:$0xff]  ;;  %v2722_v16 = vld [vmem:[%s2676_s22 + $0x10] sm:$0xff]  ;;  %p606_p8 = scmp.lt.s32.totalorder %s2184_s21, 31 }
  0x5e   : > { %v733_v2 = vmul.f32 %v2682_v1, %v2679_v0  ;;  %v618_v3 = vld [vmem:[%s2676_s22] sm:$0xff]  ;;  %v2700_v8 = vld [vmem:[%s2676_s22 + $0x188] sm:$0xff]  ;;  %v702_v11 = vmul.f32 %v2697_v7, %v2694_v6  ;;  %v2725_v17 = vld [vmem:[%s2676_s22 + $0x110] sm:$0xff]  ;;  %v719_v18 = vmul.f32 %v2719_v15, %v2722_v16 }
  0x5f   : > { %v701_v4 = vmul.f32 %v2682_v1, %v618_v3  ;;  %v2689_v5 = vmul.f32 %v2679_v0, %v618_v3  ;;  %v2703_v9 = vld [vmem:[%s2676_s22 + $0x180] sm:$0xff]  ;;  %v718_v10 = vmul.f32 %v2700_v8, %v2694_v6  ;;  %v2712_v13 = vld [vmem:[%s2676_s22 + $0x88] sm:$0xff]  ;;  %v703_v19 = vmul.f32 %v2725_v17, %v2722_v16  ;;  %v2733_v20 = vld [vmem:[%s2676_s22 + $0x90] sm:$0xff]  ;;  %s4023_s21 = smov (!%p606_p8, %s2184_s21), 31 }
  0x60   : > { %925 = vrot.lane.b32.xlu1 %v733_v2, %s2459_s23  ;;  %v717_v12 = vmul.f32 %v2703_v9, %v618_v3  ;;  %v734_v14 = vmul.f32 %v2697_v7, %v2712_v13  ;;  %v735_v21 = vmul.f32 %v2725_v17, %v2733_v20  ;;  %v2740_v22 = vld [vmem:[%s2676_s22 + $0x198] sm:$0xff]  ;;  %v2761_v29 = vld [vmem:[%s2676_s22 + $0x1a0] sm:$0xff]  ;;  %v2782_v36 = vld [vmem:[%s2676_s22 + $0x1a8] sm:$0xff]  ;;  %s2185_s26 = sshll.u32 %s4023_s21, 3 }
  0x61   : > { %797 = vrot.lane.b32.xlu0 %v701_v4, %s2460_s24  ;;  %863 = vrot.lane.b32.xlu2 %v718_v10, %s2461_s25  ;;  %v2743_v23 = vld [vmem:[%s2676_s22 + $0x18] sm:$0xff]  ;;  %v2764_v30 = vld [vmem:[%s2676_s22 + $0x20] sm:$0xff]  ;;  %s3876_s29 = scalar_lea.vmem %s3957_s0, %s2185_s26 }
  0x62   : > { %v2746_v24 = vld [vmem:[%s2676_s22 + $0x118] sm:$0xff]  ;;  %v720_v25 = vmul.f32 %v2740_v22, %v2743_v23  ;;  %v2767_v31 = vld [vmem:[%s2676_s22 + $0x120] sm:$0xff]  ;;  %v721_v32 = vmul.f32 %v2761_v29, %v2764_v30  ;;  %v2785_v37 = vld [vmem:[%s2676_s22 + $0x28] sm:$0xff] }
  0x63   : > { %v704_v26 = vmul.f32 %v2746_v24, %v2743_v23  ;;  %v2754_v27 = vld [vmem:[%s2676_s22 + $0x98] sm:$0xff]  ;;  %v705_v33 = vmul.f32 %v2767_v31, %v2764_v30  ;;  %v2775_v34 = vld [vmem:[%s2676_s22 + $0xa0] sm:$0xff]  ;;  %v2788_v38 = vld [vmem:[%s2676_s22 + $0x128] sm:$0xff]  ;;  %v722_v39 = vmul.f32 %v2782_v36, %v2785_v37 }
  0x64   : > { %v736_v28 = vmul.f32 %v2746_v24, %v2754_v27  ;;  %v737_v35 = vmul.f32 %v2767_v31, %v2775_v34  ;;  %v706_v40 = vmul.f32 %v2788_v38, %v2785_v37  ;;  %v2796_v41 = vld [vmem:[%s2676_s22 + $0xa8] sm:$0xff]  ;;  %v2803_v43 = vld [vmem:[%s2676_s22 + $0x1b0] sm:$0xff]  ;;  %v2824_v50 = vld [vmem:[%s2676_s22 + $0x1b8] sm:$0xff] }
  0x65   : > { %v738_v42 = vmul.f32 %v2788_v38, %v2796_v41  ;;  %v2806_v44 = vld [vmem:[%s2676_s22 + $0x30] sm:$0xff]  ;;  %v2827_v51 = vld [vmem:[%s2676_s22 + $0x38] sm:$0xff]  ;;  %v2845_v57 = vld [vmem:[%s2676_s22 + $0x1c0] sm:$0xff] }
  0x66   : > { %v2809_v45 = vld [vmem:[%s2676_s22 + $0x130] sm:$0xff]  ;;  %v723_v46 = vmul.f32 %v2803_v43, %v2806_v44  ;;  %v2830_v52 = vld [vmem:[%s2676_s22 + $0x138] sm:$0xff]  ;;  %v724_v53 = vmul.f32 %v2824_v50, %v2827_v51  ;;  %v2854_v60 = vld [vmem:[%s2676_s22 + $0x40] sm:$0xff] }
  0x67   : > { %v707_v47 = vmul.f32 %v2809_v45, %v2806_v44  ;;  %v2817_v48 = vld [vmem:[%s2676_s22 + $0xb0] sm:$0xff]  ;;  %v708_v54 = vmul.f32 %v2830_v52, %v2827_v51  ;;  %v2838_v55 = vld [vmem:[%s2676_s22 + $0xb8] sm:$0xff]  ;;  %v2857_v61 = vld [vmem:[%s2676_s22 + $0x140] sm:$0xff]  ;;  %v725_v62 = vmul.f32 %v2845_v57, %v2854_v60 }
  0x68   : > { %799 = vrot.lane.b32.xlu1 %v702_v11, %s2460_s24  ;;  %v739_v49 = vmul.f32 %v2809_v45, %v2817_v48  ;;  %v740_v56 = vmul.f32 %v2830_v52, %v2838_v55  ;;  %v709_v63 = vmul.f32 %v2857_v61, %v2854_v60  ;;  %v2865_v2 = vld [vmem:[%s2676_s22 + $0xc0] sm:$0xff]  ;;  %v2872_v4 = vld [vmem:[%s2676_s22 + $0x1c8] sm:$0xff]  ;;  %v2944_v59 = vld [vmem:[%s2676_s22 + $0x58] sm:$0xff] }
  0x69   : > { %861 = vrot.lane.b32.xlu0 %v717_v12, %s2461_s25  ;;  %927 = vrot.lane.b32.xlu2 %v734_v14, %s2459_s23  ;;  %v741_v3 = vmul.f32 %v2857_v61, %v2865_v2  ;;  %v1117_v10 = vld [vmem:[%s3959_s2 + $0x68] sm:$0xff]  ;;  %v1116_v11 = vld [vmem:[%s3959_s2 + $0x60] sm:$0xff]  ;;  %3991 = vst [vmem:[#allocation5_spill] sm:$0xff] %v2944_v59 }
  0x6a   : > { %v2881_v12 = vld [vmem:[%s2676_s22 + $0x48] sm:$0xff]  ;;  %1182 = vmatpush.msra.mxu0 %v1117_v10  ;;  %v1107_v10 = vld [vmem:[%s3959_s2 + $0x18] sm:$0xff] }
  0x6b   : > { %v2884_v14 = vld [vmem:[%s2676_s22 + $0x148] sm:$0xff] }
  0x6c   : > { %1183 = vmatpush.msra.mxu0 %v1116_v11 }
  0x70   : > { %865 = vrot.lane.b32.xlu1 %v719_v18, %s2461_s25  ;;  %v1115_v18 = vld [vmem:[%s3959_s2 + $0x58] sm:$0xff] }
  0x71   : > { %801 = vrot.lane.b32.xlu0 %v703_v19, %s2460_s24  ;;  %929 = vrot.lane.b32.xlu2 %v735_v21, %s2459_s23  ;;  %v726_v19 = vmul.f32 %v2872_v4, %v2881_v12  ;;  %v710_v21 = vmul.f32 %v2884_v14, %v2881_v12 }
  0x72   : > { %1184 = vmatpush.msra.mxu0 %v1115_v18  ;;  %v1106_v18 = vld [vmem:[%s3959_s2 + $0x10] sm:$0xff] }
  0x78   : > { %867 = vrot.lane.b32.xlu1 %v720_v25, %s2461_s25  ;;  %v1114_v25 = vld [vmem:[%s3959_s2 + $0x50] sm:$0xff] }
  0x79   : > { %803 = vrot.lane.b32.xlu0 %v704_v26, %s2460_s24  ;;  %931 = vrot.lane.b32.xlu2 %v736_v28, %s2459_s23  ;;  %v2898_v26 = vld [vmem:[%s2676_s22 + $0xc8] sm:$0xff] }
  0x7a   : > { %1185 = vmatpush.msra.mxu0 %v1114_v25  ;;  %v742_v28 = vmul.f32 %v2884_v14, %v2898_v26  ;;  %v2971_v25 = vld [vmem:[%s2676_s22 + $0x1e0] sm:$0xff] }
  0x80   : > { %869 = vrot.lane.b32.xlu1 %v721_v32, %s2461_s25  ;;  %v2905_v32 = vld [vmem:[%s2676_s22 + $0x1d0] sm:$0xff] }
  0x81   : > { %805 = vrot.lane.b32.xlu0 %v705_v33, %s2460_s24  ;;  %933 = vrot.lane.b32.xlu2 %v737_v35, %s2459_s23  ;;  %v1113_v33 = vld [vmem:[%s3959_s2 + $0x48] sm:$0xff]  ;;  %v1112_v35 = vld [vmem:[%s3959_s2 + $0x40] sm:$0xff] }
  0x82   : > { %1186 = vmatpush.msra.mxu0 %v1113_v33  ;;  %v2977_v33 = vld [vmem:[%s2676_s22 + $0x60] sm:$0xff] }
  0x83   : > { %3993 = vst [vmem:[#allocation7_spill] sm:$0xff] %v2977_v33 }
  0x84   : > { %1187 = vmatpush.msra.mxu0 %v1112_v35  ;;  %v2980_v35 = vld [vmem:[%s2676_s22 + $0x160] sm:$0xff] }
  0x88   : > { %871 = vrot.lane.b32.xlu1 %v722_v39, %s2461_s25  ;;  %v2914_v39 = vld [vmem:[%s2676_s22 + $0x50] sm:$0xff] }
  0x89   : > { %807 = vrot.lane.b32.xlu0 %v706_v40, %s2460_s24  ;;  %935 = vrot.lane.b32.xlu2 %v738_v42, %s2459_s23  ;;  %v2917_v40 = vld [vmem:[%s2676_s22 + $0x150] sm:$0xff]  ;;  %v1111_v42 = vld [vmem:[%s3959_s2 + $0x38] sm:$0xff] }
  0x8a   : > { %1188 = vmatpush.msra.mxu0 %v1111_v42  ;;  %v729_v42 = vmul.f32 %v2971_v25, %v2977_v33 }
  0x90   : > { %873 = vrot.lane.b32.xlu1 %v723_v46, %s2461_s25  ;;  %v727_v46 = vmul.f32 %v2905_v32, %v2914_v39 }
  0x91   : > { %809 = vrot.lane.b32.xlu0 %v707_v47, %s2460_s24  ;;  %937 = vrot.lane.b32.xlu2 %v739_v49, %s2459_s23  ;;  %v711_v47 = vmul.f32 %v2917_v40, %v2914_v39  ;;  %v1110_v49 = vld [vmem:[%s3959_s2 + $0x30] sm:$0xff] }
  0x92   : > { %1189 = vmatpush.msra.mxu0 %v1110_v49 }
  0x94   : > { %1190 = vmatpush.msra.mxu0 %v1109_v58  ;;  %v2996_v58 = vld [vmem:[%s2676_s22 + $0xe0] sm:$0xff] }
  0x95   : > { %3994 = vst [vmem:[#allocation8_spill] sm:$0xff] %v2996_v58 }
  0x98   : > { %875 = vrot.lane.b32.xlu1 %v724_v53, %s2461_s25  ;;  %v2931_v53 = vld [vmem:[%s2676_s22 + $0xd0] sm:$0xff] }
  0x99   : > { %811 = vrot.lane.b32.xlu0 %v708_v54, %s2460_s24  ;;  %939 = vrot.lane.b32.xlu2 %v740_v56, %s2459_s23  ;;  %3990 = vst [vmem:[#allocation4_spill] sm:$0xff] %v2931_v53  ;;  %v743_v54 = vmul.f32 %v2917_v40, %v2931_v53  ;;  %v2938_v56 = vld [vmem:[%s2676_s22 + $0x1d8] sm:$0xff] }
  0xa0   : > { %877 = vrot.lane.b32.xlu1 %v725_v62, %s2461_s25  ;;  %v2947_v62 = vld [vmem:[%s2676_s22 + $0x158] sm:$0xff] }
  0xa1   : > { %813 = vrot.lane.b32.xlu0 %v709_v63, %s2460_s24  ;;  %941 = vrot.lane.b32.xlu2 %v741_v3, %s2459_s23  ;;  %v728_v63 = vmul.f32 %v2938_v56, %v2944_v59  ;;  %v1108_v3 = vld [vmem:[%s3959_s2 + $0x20] sm:$0xff]  ;;  %v712_v11 = vmul.f32 %v2947_v62, %v2944_v59 }
  0xa2   : > { %1191 = vmatpush.msra.mxu0 %v1108_v3  ;;  %v3003_v3 = vld [vmem:[%s2676_s22 + $0x1e8] sm:$0xff] }
  0xa4   : > { %1192 = vmatpush.msra.mxu0 %v1107_v10  ;;  %v3006_v10 = vld [vmem:[%s2676_s22 + $0x68] sm:$0xff] }
  0xa5   : > { %3995 = vst [vmem:[#allocation9_spill] sm:$0xff] %v3006_v10 }
  0xa6   : > { %1193 = vmatpush.msra.mxu0 %v1106_v18  ;;  %v730_v18 = vmul.f32 %v3003_v3, %v3006_v10 }
  0xa8   : > { %879 = vrot.lane.b32.xlu1 %v726_v19, %s2461_s25  ;;  %v2964_v19 = vld [vmem:[%s2676_s22 + $0xd8] sm:$0xff] }
  0xa9   : > { %815 = vrot.lane.b32.xlu0 %v710_v21, %s2460_s24  ;;  %943 = vrot.lane.b32.xlu2 %v742_v28, %s2459_s23  ;;  %3992 = vst [vmem:[#allocation6_spill] sm:$0xff] %v2964_v19  ;;  %v744_v21 = vmul.f32 %v2947_v62, %v2964_v19  ;;  %v1105_v28 = vld [vmem:[%s3959_s2 + $0x8] sm:$0xff] }
  0xaa   : > { %1194 = vmatpush.msra.mxu0 %v1105_v28 }
  0xb0   : > { %881 = vrot.lane.b32.xlu1 %v727_v46, %s2461_s25  ;;  %v1104_v46 = vld [vmem:[%s3959_s2] sm:$0xff] }
  0xb1   : > { %817 = vrot.lane.b32.xlu0 %v711_v47, %s2460_s24  ;;  %945 = vrot.lane.b32.xlu2 %v743_v54, %s2459_s23  ;;  %v713_v47 = vmul.f32 %v2980_v35, %v2977_v33  ;;  %v1127_v54 = vld [vmem:[%s3959_s2 + $0xb8] sm:$0xff] }
  0xb2   : > { %1195 = vmatpush.msra.mxu0 %v1104_v46  ;;  %2321 = vmatpush.msra.mxu1 %v1127_v54  ;;  %v3054_v33 = vld [vmem:[%s2676_s22 + $0x178] sm:$0xff] }
  0xb4   : > { %1253 = vmatpush.msrb.mxu0 %v1127_v54  ;;  %v3027_v54 = vld [vmem:[%s2676_s22 + $0x70] sm:$0xff] }
  0xb5   : > { %3998 = vst [vmem:[#allocation12_spill] sm:$0xff] %v3027_v54 }
  0xb8   : > { %883 = vrot.lane.b32.xlu1 %v728_v63, %s2461_s25  ;;  %v745_v63 = vmul.f32 %v2980_v35, %v2996_v58  ;;  %v3051_v58 = vld [vmem:[%s2676_s22 + $0x78] sm:$0xff] }
  0xb9   : > { %819 = vrot.lane.b32.xlu0 %v712_v11, %s2460_s24  ;;  %947 = vrot.lane.b32.xlu2 %v744_v21, %s2459_s23  ;;  %v3009_v11 = vld [vmem:[%s2676_s22 + $0x168] sm:$0xff]  ;;  %4002 = vst [vmem:[#allocation16_spill] sm:$0xff] %v3051_v58 }
  0xba   : > { %v714_v21 = vmul.f32 %v3009_v11, %v3006_v10  ;;  %v3041_v10 = vld [vmem:[%s2676_s22 + $0xf0] sm:$0xff] }
  0xbb   : > { %v2990_v49 = vpop.permute.xlu2 %863  ;;  %4000 = vst [vmem:[#allocation14_spill] sm:$0xff] %v3041_v10 }
  0xc0   : > { %885 = vrot.lane.b32.xlu1 %v729_v42, %s2461_s25  ;;  %v3017_v42 = vld [vmem:[%s2676_s22 + $0xe8] sm:$0xff] }
  0xc1   : > { %821 = vrot.lane.b32.xlu0 %v713_v47, %s2460_s24  ;;  %949 = vrot.lane.b32.xlu2 %v745_v63, %s2459_s23  ;;  %3996 = vst [vmem:[#allocation10_spill] sm:$0xff] %v3017_v42  ;;  %v746_v46 = vmul.f32 %v3009_v11, %v3017_v42  ;;  %v3024_v47 = vld [vmem:[%s2676_s22 + $0x1f0] sm:$0xff] }
  0xc2   : > { %3997 = vst [vmem:[#allocation11_spill] sm:$0xff] %v3024_v47  ;;  %v3030_v63 = vld [vmem:[%s2676_s22 + $0x170] sm:$0xff]  ;;  %v731_v0 = vmul.f32 %v3024_v47, %v3027_v54 }
  0xc3   : > { %v928_v28 = vpop.permute.xlu2 %927  ;;  %3999 = vst [vmem:[#allocation13_spill] sm:$0xff] %v3030_v63  ;;  %v747_v47 = vmul.f32 %v3030_v63, %v3041_v10 }
  0xc8   : > { %887 = vrot.lane.b32.xlu1 %v730_v18, %s2461_s25  ;;  %v715_v18 = vmul.f32 %v3030_v63, %v3027_v54 }
  0xc9   : > { %823 = vrot.lane.b32.xlu0 %v714_v21, %s2460_s24  ;;  %951 = vrot.lane.b32.xlu2 %v746_v46, %s2459_s23  ;;  %v1126_v21 = vld [vmem:[%s3959_s2 + $0xb0] sm:$0xff]  ;;  %v3048_v46 = vld [vmem:[%s2676_s22 + $0x1f8] sm:$0xff] }
  0xca   : > { %1254 = vmatpush.msrb.mxu0 %v1126_v21  ;;  %2322 = vmatpush.msra.mxu1 %v1126_v21  ;;  %4001 = vst [vmem:[#allocation15_spill] sm:$0xff] %v3048_v46  ;;  %v732_v59 = vmul.f32 %v3048_v46, %v3051_v58  ;;  %v3062_v21 = vld [vmem:[%s2676_s22 + $0xf8] sm:$0xff] }
  0xcb   : > { %v930_v42 = vpop.permute.xlu2 %929  ;;  %4003 = vst [vmem:[#allocation17_spill] sm:$0xff] %v3062_v21  ;;  %v748_v10 = vmul.f32 %v3054_v33, %v3062_v21 }
  0xd0   : > { %889 = vrot.lane.b32.xlu1 %v731_v0, %s2461_s25  ;;  %v716_v0 = vmul.f32 %v3054_v33, %v3051_v58  ;;  %v686_v58 = vmul.f32 %v2712_v13, %v2694_v6 }
  0xd1   : > { %825 = vrot.lane.b32.xlu0 %v715_v18, %s2460_s24  ;;  %953 = vrot.lane.b32.xlu2 %v747_v47, %s2459_s23 }
  0xd2   : > { %v926_v54 = vpop.permute.xlu1 %925 }
  0xd3   : > { %v798_v19 = vpop.permute.xlu0 %797  ;;  %v932_v18 = vpop.permute.xlu2 %931 }
  0xd4   : > { %v1038_v47 = vsel %vm1037_vm0, %v2689_v5, %v798_v19  ;;  %v1125_v5 = vld [vmem:[%s3959_s2 + $0xa8] sm:$0xff] }
  0xd5   : > { %1255 = vmatpush.msrb.mxu0 %v1125_v5  ;;  %2323 = vmatpush.msra.mxu1 %v1125_v5  ;;  %v771_v5 = vmul.f32 %v2803_v43, %v2809_v45  ;;  %v689_v45 = vmul.f32 %v2775_v34, %v2764_v30  ;;  %v690_v30 = vmul.f32 %v2796_v41, %v2785_v37 }
  0xd8   : > { %891 = vrot.lane.b32.xlu1 %v732_v59, %s2461_s25  ;;  %v766_v59 = vmul.f32 %v2700_v8, %v2697_v7  ;;  %v687_v7 = vmul.f32 %v2733_v20, %v2722_v16  ;;  %v767_v16 = vmul.f32 %v2719_v15, %v2725_v17  ;;  %v772_v17 = vmul.f32 %v2824_v50, %v2830_v52 }
  0xd9   : > { %827 = vrot.lane.b32.xlu0 %v716_v0, %s2460_s24  ;;  %955 = vrot.lane.b32.xlu2 %v748_v10, %s2459_s23  ;;  %v765_v0 = vmul.f32 %v2703_v9, %v2682_v1 }
  0xda   : > { %v800_v63 = vpop.permute.xlu1 %799 }
  0xdb   : > { %v862_v46 = vpop.permute.xlu0 %861  ;;  %v1039_v6 = vsel %vm1037_vm0, %v686_v58, %v800_v63  ;;  %v934_v19 = vpop.permute.xlu2 %933 }
  0xdc   : > { %v1055_v53 = vsel %vm1054_vm1, %v1038_v47, %v862_v46  ;;  %v1056_v1 = vsel %vm1054_vm1, %v1039_v6, %v2990_v49  ;;  %v768_v46 = vmul.f32 %v2740_v22, %v2746_v24  ;;  %v770_v6 = vmul.f32 %v2782_v36, %v2788_v38 }
  0xdd   : > { %v3077_v21 = vsel %vm1071_vm2, %v1055_v53, %v926_v54  ;;  %v769_v54 = vmul.f32 %v2761_v29, %v2767_v31  ;;  %v3096_v63 = vsel %vm1071_vm2, %v1056_v1, %v928_v28  ;;  %v688_v31 = vmul.f32 %v2754_v27, %v2743_v23  ;;  %v1124_v23 = vld [vmem:[%s3959_s2 + $0xa0] sm:$0xff] }
  0xde   : > { %1196 = vmatmul.f32.vlgmr.msra.gmra.mxu0 %v3077_v21  ;;  %2324 = vmatpush.msra.mxu1 %v1124_v23 }
  0xdf   : > { %1256 = vmatpush.msrb.mxu0 %v1124_v23  ;;  %v692_v23 = vmul.f32 %v2838_v55, %v2827_v51 }
  0xe0   : > { %991 = vrot.lane.b32.xlu1 %v766_v59, %s2460_s24 }
  0xe1   : > { %989 = vrot.lane.b32.xlu0 %v765_v0, %s2460_s24  ;;  %993 = vrot.lane.b32.xlu2 %v767_v16, %s2460_s24 }
  0xe2   : > { %v866_v53 = vpop.permute.xlu1 %865 }
  0xe3   : > { %v802_v10 = vpop.permute.xlu0 %801  ;;  %v936_v59 = vpop.permute.xlu2 %935 }
  0xe4   : > { %v1040_v58 = vsel %vm1037_vm0, %v687_v7, %v802_v10  ;;  %v774_v10 = vmul.f32 %v2872_v4, %v2884_v14  ;;  %v1123_v14 = vld [vmem:[%s3959_s2 + $0x98] sm:$0xff] }
  0xe5   : > { %v1057_v49 = vsel %vm1054_vm1, %v1040_v58, %v866_v53  ;;  %1257 = vmatpush.msrb.mxu0 %v1123_v14  ;;  %2325 = vmatpush.msra.mxu1 %v1123_v14 }
  0xe6   : > { %1199 = vmatmul.f32.gmra.mxu0 %v3096_v63  ;;  %v3110_v24 = vsel %vm1071_vm2, %v1057_v49, %v930_v42  ;;  %v775_v49 = vmul.f32 %v2905_v32, %v2917_v40  ;;  %v773_v40 = vmul.f32 %v2845_v57, %v2857_v61  ;;  %v1122_v61 = vld [vmem:[%s3959_s2 + $0x90] sm:$0xff] }
  0xe7   : > { %1258 = vmatpush.msrb.mxu0 %v1122_v61  ;;  %2326 = vmatpush.msra.mxu1 %v1122_v61 }
  0xe8   : > { %997 = vrot.lane.b32.xlu1 %v769_v54, %s2460_s24 }
  0xe9   : > { %995 = vrot.lane.b32.xlu0 %v768_v46, %s2460_s24  ;;  %999 = vrot.lane.b32.xlu2 %v770_v6, %s2460_s24 }
  0xea   : > { %v868_v28 = vpop.permute.xlu1 %867 }
  0xeb   : > { %v804_v47 = vpop.permute.xlu0 %803  ;;  %v938_v53 = vpop.permute.xlu2 %937 }
  0xec   : > { %v1041_v0 = vsel %vm1037_vm0, %v688_v31, %v804_v47 }
  0xed   : > { %v1058_v42 = vsel %vm1054_vm1, %v1041_v0, %v868_v28 }
  0xee   : > { %1202 = vmatmul.f32.gmra.mxu0 %v3110_v24  ;;  %v3130_v1 = vsel %vm1071_vm2, %v1058_v42, %v932_v18 }
  0xf0   : > { %1003 = vrot.lane.b32.xlu1 %v772_v17, %s2460_s24 }
  0xf1   : > { %1001 = vrot.lane.b32.xlu0 %v771_v5, %s2460_s24  ;;  %1005 = vrot.lane.b32.xlu2 %v773_v40, %s2460_s24 }
  0xf2   : > { %v870_v52 = vpop.permute.xlu1 %869 }
  0xf3   : > { %v806_v7 = vpop.permute.xlu0 %805  ;;  %v940_v31 = vpop.permute.xlu2 %939 }
  0xf4   : > { %v1042_v38 = vsel %vm1037_vm0, %v689_v45, %v806_v7  ;;  %v693_v7 = vmul.f32 %v2865_v2, %v2854_v60  ;;  %v694_v60 = vmul.f32 %v2898_v26, %v2881_v12 }
  0xf5   : > { %v1059_v54 = vsel %vm1054_vm1, %v1042_v38, %v870_v52  ;;  %v777_v52 = vmul.f32 %v2971_v25, %v2980_v35  ;;  %v778_v35 = vmul.f32 %v3003_v3, %v3009_v11  ;;  %v1121_v11 = vld [vmem:[%s3959_s2 + $0x88] sm:$0xff] }
  0xf6   : > { %1205 = vmatmul.f32.gmra.mxu0 %v3130_v1  ;;  %v3141_v18 = vsel %vm1071_vm2, %v1059_v54, %v934_v19  ;;  %v691_v19 = vmul.f32 %v2817_v48, %v2806_v44  ;;  %2327 = vmatpush.msra.mxu1 %v1121_v11 }
  0xf7   : > { %1259 = vmatpush.msrb.mxu0 %v1121_v11 }
  0xf8   : > { %1009 = vrot.lane.b32.xlu1 %v775_v49, %s2460_s24 }
  0xf9   : > { %1007 = vrot.lane.b32.xlu0 %v774_v10, %s2460_s24 }
  0xfa   : > { %v872_v58 = vpop.permute.xlu1 %871 }
  0xfb   : > { %v808_v46 = vpop.permute.xlu0 %807  ;;  %v942_v6 = vpop.permute.xlu2 %941 }
  0xfc   : > { %v1043_v16 = vsel %vm1037_vm0, %v690_v30, %v808_v46 }
  0xfd   : > { %v1060_v37 = vsel %vm1054_vm1, %v1043_v16, %v872_v58 }
  0xfe   : > { %1208 = vmatmul.f32.gmra.mxu0 %v3141_v18  ;;  %v3155_v17 = vsel %vm1071_vm2, %v1060_v37, %v936_v59 }
 0x100   : > { %1015 = vrot.lane.b32.xlu1 %v778_v35, %s2460_s24 }
 0x101   : > { %1013 = vrot.lane.b32.xlu0 %v777_v52, %s2460_s24 }
 0x102   : > { %v874_v28 = vpop.permute.xlu1 %873 }
 0x103   : > { %v810_v47 = vpop.permute.xlu0 %809  ;;  %v944_v54 = vpop.permute.xlu2 %943 }
 0x104   : > { %v1044_v0 = vsel %vm1037_vm0, %v691_v19, %v810_v47  ;;  %v4004_v19 = vld [vmem:[#allocation4_spill] sm:$0xff] }
 0x105   : > { %v1061_v5 = vsel %vm1054_vm1, %v1044_v0, %v874_v28  ;;  %v695_v28 = vmul.f32 %v4004_v19, %v2914_v39 }
 0x106   : > { %1211 = vmatmul.f32.gmra.mxu0 %v3155_v17  ;;  %v3166_v59 = vsel %vm1071_vm2, %v1061_v5, %v938_v53 }
 0x10a   : > { %v876_v44 = vpop.permute.xlu1 %875 }
 0x10b   : > { %v812_v42 = vpop.permute.xlu0 %811  ;;  %v946_v37 = vpop.permute.xlu2 %945 }
 0x10c   : > { %v1045_v45 = vsel %vm1037_vm0, %v692_v23, %v812_v42  ;;  %v4006_v42 = vld [vmem:[#allocation5_spill] sm:$0xff] }
 0x10d   : > { %v1062_v51 = vsel %vm1054_vm1, %v1045_v45, %v876_v44  ;;  %v4007_v45 = vld [vmem:[#allocation6_spill] sm:$0xff] }
 0x10e   : > { %1214 = vmatmul.f32.gmra.mxu0 %v3166_v59  ;;  %v3180_v10 = vsel %vm1071_vm2, %v1062_v51, %v940_v31  ;;  %v776_v31 = vmul.f32 %v2938_v56, %v2947_v62  ;;  %v4005_v62 = vld [vmem:[#allocation15_spill] sm:$0xff]  ;;  %v696_v39 = vmul.f32 %v4007_v45, %v4006_v42 }
 0x10f   : > { %v780_v23 = vmul.f32 %v4005_v62, %v3054_v33  ;;  %v1120_v33 = vld [vmem:[%s3959_s2 + $0x80] sm:$0xff] }
 0x110   : > { %1011 = vrot.lane.b32.xlu2 %v776_v31, %s2460_s24  ;;  %1260 = vmatpush.msrb.mxu0 %v1120_v33 }
 0x111   : > { %1019 = vrot.lane.b32.xlu0 %v780_v23, %s2460_s24  ;;  %2328 = vmatpush.msra.mxu1 %v1120_v33 }
 0x112   : > { %v878_v38 = vpop.permute.xlu1 %877 }
 0x113   : > { %v814_v53 = vpop.permute.xlu0 %813 }
 0x114   : > { %v1046_v30 = vsel %vm1037_vm0, %v693_v7, %v814_v53  ;;  %v4008_v53 = vld [vmem:[#allocation7_spill] sm:$0xff] }
 0x115   : > { %v1063_v58 = vsel %vm1054_vm1, %v1046_v30, %v878_v38 }
 0x116   : > { %1217 = vmatmul.f32.gmra.mxu0 %v3180_v10  ;;  %v3191_v14 = vsel %vm1071_vm2, %v1063_v58, %v942_v6  ;;  %v948_v6 = vpop.permute.xlu2 %947 }
 0x11a   : > { %v880_v46 = vpop.permute.xlu1 %879 }
 0x11b   : > { %v816_v16 = vpop.permute.xlu0 %815 }
 0x11c   : > { %v1047_v49 = vsel %vm1037_vm0, %v694_v60, %v816_v16 }
 0x11d   : > { %v1064_v12 = vsel %vm1054_vm1, %v1047_v49, %v880_v46  ;;  %v4010_v49 = vld [vmem:[#allocation13_spill] sm:$0xff] }
 0x11e   : > { %1220 = vmatmul.f32.gmra.mxu0 %v3191_v14  ;;  %v3205_v40 = vsel %vm1071_vm2, %v1064_v12, %v944_v54  ;;  %v4009_v54 = vld [vmem:[#allocation8_spill] sm:$0xff]  ;;  %v950_v58 = vpop.permute.xlu2 %949  ;;  %v4012_v12 = vld [vmem:[#allocation9_spill] sm:$0xff] }
 0x11f   : > { %v697_v30 = vmul.f32 %v4009_v54, %v4008_v53 }
 0x122   : > { %v882_v47 = vpop.permute.xlu1 %881 }
 0x123   : > { %v818_v0 = vpop.permute.xlu0 %817 }
 0x124   : > { %v1048_v5 = vsel %vm1037_vm0, %v695_v28, %v818_v0  ;;  %v4013_v28 = vld [vmem:[#allocation10_spill] sm:$0xff] }
 0x125   : > { %v1065_v44 = vsel %vm1054_vm1, %v1048_v5, %v882_v47  ;;  %v698_v47 = vmul.f32 %v4013_v28, %v4012_v12 }
 0x126   : > { %1223 = vmatmul.f32.gmra.mxu0 %v3205_v40  ;;  %v3216_v51 = vsel %vm1071_vm2, %v1065_v44, %v946_v37  ;;  %v4011_v37 = vld [vmem:[#allocation11_spill] sm:$0xff]  ;;  %v952_v44 = vpop.permute.xlu2 %951 }
 0x127   : > { %v779_v11 = vmul.f32 %v4011_v37, %v4010_v49 }
 0x129   : > { %1017 = vrot.lane.b32.xlu2 %v779_v11, %s2460_s24  ;;  %s3883_s24 = scalar_lea.vmem %s3965_s8, %s2185_s26 }
 0x12a   : > { %v884_v61 = vpop.permute.xlu1 %883 }
 0x12b   : > { %v820_v52 = vpop.permute.xlu0 %819 }
 0x12c   : > { %v1049_v7 = vsel %vm1037_vm0, %v696_v39, %v820_v52  ;;  %v4014_v39 = vld [vmem:[#allocation12_spill] sm:$0xff] }
 0x12d   : > { %v1066_v38 = vsel %vm1054_vm1, %v1049_v7, %v884_v61  ;;  %v4015_v61 = vld [vmem:[#allocation14_spill] sm:$0xff] }
 0x12e   : > { %1226 = vmatmul.f32.gmra.mxu0 %v3216_v51  ;;  %v3227_v46 = vsel %vm1071_vm2, %v1066_v38, %v948_v6  ;;  %v699_v52 = vmul.f32 %v4015_v61, %v4014_v39 }
 0x132   : > { %v886_v35 = vpop.permute.xlu1 %885 }
 0x133   : > { %v822_v60 = vpop.permute.xlu0 %821 }
 0x134   : > { %v1050_v16 = vsel %vm1037_vm0, %v697_v30, %v822_v60  ;;  %v954_v30 = vpop.permute.xlu2 %953  ;;  %v4017_v60 = vld [vmem:[#allocation17_spill] sm:$0xff] }
 0x135   : > { %v1067_v31 = vsel %vm1054_vm1, %v1050_v16, %v886_v35 }
 0x136   : > { %1229 = vmatmul.f32.gmra.mxu0 %v3227_v46  ;;  %v3238_v23 = vsel %vm1071_vm2, %v1067_v31, %v950_v58  ;;  %v4016_v58 = vld [vmem:[#allocation16_spill] sm:$0xff] }
 0x137   : > { %v700_v16 = vmul.f32 %v4017_v60, %v4016_v58 }
 0x13a   : > { %v888_v0 = vpop.permute.xlu1 %887 }
 0x13b   : > { %v824_v5 = vpop.permute.xlu0 %823 }
 0x13c   : > { %v1051_v6 = vsel %vm1037_vm0, %v698_v47, %v824_v5 }
 0x13d   : > { %v1068_v42 = vsel %vm1054_vm1, %v1051_v6, %v888_v0  ;;  %v956_v0 = vpop.permute.xlu2 %955 }
 0x13e   : > { %1232 = vmatmul.f32.gmra.mxu0 %v3238_v23  ;;  %v3246_v38 = vsel %vm1071_vm2, %v1068_v42, %v952_v44  ;;  %v4018_v42 = vld [vmem:[#allocation3_spill] sm:$0xff] }
 0x13f   : > { %v749_v39 = vmul.f32 %v2703_v9, %v4018_v42  ;;  %v753_v9 = vmul.f32 %v2761_v29, %v2775_v34  ;;  %v754_v29 = vmul.f32 %v2782_v36, %v2796_v41  ;;  %v755_v36 = vmul.f32 %v2803_v43, %v2817_v48 }
 0x140   : > { %v757_v43 = vmul.f32 %v2845_v57, %v2865_v2  ;;  %v759_v57 = vmul.f32 %v2905_v32, %v4004_v19  ;;  %v761_v32 = vmul.f32 %v2971_v25, %v4009_v54  ;;  %v762_v25 = vmul.f32 %v3003_v3, %v4013_v28  ;;  %v1333_v28 = vld [vmem:[%s3961_s4 + $0x38] sm:$0xff] }
 0x141   : > { %v763_v3 = vmul.f32 %v4011_v37, %v4015_v61  ;;  %v1331_v37 = vld [vmem:[%s3961_s4 + $0x28] sm:$0xff]  ;;  %v1330_v61 = vld [vmem:[%s3961_s4 + $0x20] sm:$0xff] }
 0x142   : > { %v890_v7 = vpop.permute.xlu1 %889 }
 0x143   : > { %v826_v33 = vpop.permute.xlu0 %825 }
 0x144   : > { %v1052_v53 = vsel %vm1037_vm0, %v699_v52, %v826_v33  ;;  %v752_v52 = vmul.f32 %v2740_v22, %v2754_v27  ;;  %v750_v22 = vmul.f32 %v2700_v8, %v2712_v13  ;;  %v751_v8 = vmul.f32 %v2719_v15, %v2733_v20 }
 0x145   : > { %v1069_v35 = vsel %vm1054_vm1, %v1052_v53, %v890_v7 }
 0x146   : > { %1235 = vmatmul.f32.gmra.mxu0 %v3246_v38  ;;  %v3254_v11 = vsel %vm1071_vm2, %v1069_v35, %v954_v30  ;;  %v994_v35 = vpop.permute.xlu2 %993 }
 0x14a   : > { %v892_v31 = vpop.permute.xlu1 %891 }
 0x14b   : > { %v828_v49 = vpop.permute.xlu0 %827 }
 0x14c   : > { %v1053_v12 = vsel %vm1037_vm0, %v700_v16, %v828_v49 }
 0x14d   : > { %v1070_v47 = vsel %vm1054_vm1, %v1053_v12, %v892_v31  ;;  %v3305_v12 = vsel %vm1037_vm0, %v751_v8, %v994_v35 }
 0x14e   : > { %1238 = vmatmul.f32.gmra.mxu0 %v3254_v11  ;;  %v3260_v44 = vsel %vm1071_vm2, %v1070_v47, %v956_v0  ;;  %v1000_v34 = vpop.permute.xlu2 %999  ;;  %v756_v47 = vmul.f32 %v2824_v50, %v2838_v55  ;;  %v758_v50 = vmul.f32 %v2872_v4, %v2898_v26  ;;  %v760_v4 = vmul.f32 %v2938_v56, %v4007_v45  ;;  %v1337_v56 = vld [vmem:[%s3961_s4 + $0x58] sm:$0xff]  ;;  %v1336_v45 = vld [vmem:[%s3961_s4 + $0x50] sm:$0xff] }
 0x14f   : > { %v3300_v13 = vsel %vm1037_vm0, %v754_v29, %v1000_v34  ;;  %1390 = vmatpush.msra.mxu0 %v1337_v56  ;;  %2329 = vmatpush.msra.mxu2 %v1337_v56 }
 0x151   : > { %1391 = vmatpush.msra.mxu0 %v1336_v45  ;;  %2330 = vmatpush.msra.mxu2 %v1336_v45 }
 0x152   : > { %v992_v6 = vpop.permute.xlu1 %991 }
 0x153   : > { %v990_v5 = vpop.permute.xlu0 %989  ;;  %v3289_v49 = vsel %vm1037_vm0, %v750_v22, %v992_v6 }
 0x154   : > { %v3268_v7 = vsel %vm1037_vm0, %v749_v39, %v990_v5 }
 0x156   : > { %1241 = vmatmul.f32.gmra.mxu0 %v3260_v44  ;;  %v1006_v48 = vpop.permute.xlu2 %1005 }
 0x157   : > { %v3332_v42 = vsel %vm1037_vm0, %v757_v43, %v1006_v48  ;;  %v1332_v43 = vld [vmem:[%s3961_s4 + $0x30] sm:$0xff] }
 0x15a   : > { %v998_v27 = vpop.permute.xlu1 %997 }
 0x15b   : > { %v996_v33 = vpop.permute.xlu0 %995  ;;  %v3270_v53 = vpop.f32.mrf.mxu0  ;;  %v3284_v58 = vsel %vm1037_vm0, %v753_v9, %v998_v27 }
 0x15c   : > { %v3273_v30 = vsel %vm1037_vm0, %v752_v52, %v996_v33 }
 0x15d   : > { %2239 = vmatmul.msk.f32.vlgmr.msra.gmra.mxu1 %vm1054_vm1, %v3273_v30 }
 0x15e   : > { %2236 = vmatmul.msk.f32.vlgmr.msrb.gmra.mxu0 %vm1054_vm1, %v3268_v7 }
 0x162   : > { %v1004_v0 = vpop.permute.xlu1 %1003 }
 0x163   : > { %v3286_v16 = vpop.f32.mrf.mxu0  ;;  %v1002_v41 = vpop.permute.xlu0 %1001  ;;  %v3323_v5 = vsel %vm1037_vm0, %v756_v47, %v1004_v0  ;;  %v1334_v47 = vld [vmem:[%s3961_s4 + $0x40] sm:$0xff] }
 0x164   : > { %v3314_v15 = vsel %vm1037_vm0, %v755_v36, %v1002_v41  ;;  %v1335_v41 = vld [vmem:[%s3961_s4 + $0x48] sm:$0xff] }
 0x165   : > { %2240 = vmatmul.msk.f32.gmra.mxu1 %vm1054_vm1, %v3284_v58  ;;  %1392 = vmatpush.msra.mxu0 %v1335_v41 }
 0x166   : > { %2237 = vmatmul.msk.f32.gmra.mxu0 %vm1054_vm1, %v3289_v49  ;;  %2331 = vmatpush.msra.mxu2 %v1335_v41 }
 0x167   : > { %1393 = vmatpush.msra.mxu0 %v1334_v47 }
 0x168   : > { %2332 = vmatpush.msra.mxu2 %v1334_v47 }
 0x169   : > { %1394 = vmatpush.msra.mxu0 %v1333_v28 }
 0x16a   : > { %v1010_v2 = vpop.permute.xlu1 %1009  ;;  %v1012_v26 = vpop.permute.xlu2 %1011  ;;  %2333 = vmatpush.msra.mxu2 %v1333_v28 }
 0x16b   : > { %v3302_v31 = vpop.f32.mrf.mxu0  ;;  %v1008_v55 = vpop.permute.xlu0 %1007  ;;  %v3350_v35 = vsel %vm1037_vm0, %v759_v57, %v1010_v2  ;;  %v3359_v22 = vsel %vm1037_vm0, %v760_v4, %v1012_v26  ;;  %1395 = vmatpush.msra.mxu0 %v1332_v43  ;;  %v1329_v57 = vld [vmem:[%s3961_s4 + $0x18] sm:$0xff]  ;;  %v1328_v26 = vld [vmem:[%s3961_s4 + $0x10] sm:$0xff] }
 0x16c   : > { %v3341_v52 = vsel %vm1037_vm0, %v758_v50, %v1008_v55  ;;  %2334 = vmatpush.msra.mxu2 %v1332_v43  ;;  %v764_v55 = vmul.f32 %v4005_v62, %v4017_v60  ;;  %v1327_v62 = vld [vmem:[%s3961_s4 + $0x8] sm:$0xff]  ;;  %v1326_v60 = vld [vmem:[%s3961_s4] sm:$0xff] }
 0x16d   : > { %2241 = vmatmul.msk.f32.gmra.mxu1 %vm1054_vm1, %v3300_v13  ;;  %1396 = vmatpush.msra.mxu0 %v1331_v37 }
 0x16e   : > { %2238 = vmatmul.msk.f32.gmra.mxu0 %vm1054_vm1, %v3305_v12  ;;  %2335 = vmatpush.msra.mxu2 %v1331_v37 }
 0x16f   : > { %1397 = vmatpush.msra.mxu0 %v1330_v61 }
 0x170   : > { %2336 = vmatpush.msra.mxu2 %v1330_v61 }
 0x171   : > { %1398 = vmatpush.msra.mxu0 %v1329_v57 }
 0x172   : > { %v1016_v54 = vpop.permute.xlu1 %1015  ;;  %2337 = vmatpush.msra.mxu2 %v1329_v57 }
 0x173   : > { %v3316_v20 = vpop.f32.mrf.mxu0  ;;  %v1014_v19 = vpop.permute.xlu0 %1013  ;;  %v3383_v8 = vsel %vm1037_vm0, %v762_v25, %v1016_v54  ;;  %1399 = vmatpush.msra.mxu0 %v1328_v26  ;;  %v3446_v25 = vld [vmem:[%s3960_s3] ss:$0 sm:$0xff] }
 0x174   : > { %v3368_v29 = vsel %vm1037_vm0, %v761_v32, %v1014_v19  ;;  %2338 = vmatpush.msra.mxu2 %v1328_v26  ;;  %v1198_v54 = vadd.f32 %v3446_v25, %v3270_v53  ;;  %v1201_v43 = vadd.f32 %v3446_v25, %v3286_v16 }
 0x175   : > { %2242 = vmatmul.msk.f32.gmra.mxu1 %vm1054_vm1, %v3314_v15  ;;  %1400 = vmatpush.msra.mxu0 %v1327_v62 }
 0x176   : > { %2339 = vmatpush.msra.mxu2 %v1327_v62  ;;  %v1204_v62 = vadd.f32 %v3446_v25, %v3302_v31 }
 0x177   : > { %1401 = vmatpush.msra.mxu0 %v1326_v60 }
 0x178   : > { %2340 = vmatpush.msra.mxu2 %v1326_v60 }
 0x17b   : > { %v3325_v6 = vpop.f32.mrf.mxu0 }
 0x17d   : > { %2243 = vmatmul.msk.f32.gmra.mxu1 %vm1054_vm1, %v3323_v5 }
 0x183   : > { %v3334_v39 = vpop.f32.mrf.mxu0  ;;  %v1018_v0 = vpop.permute.xlu2 %1017 }
 0x184   : > { %v3404_v48 = vsel %vm1037_vm0, %v763_v3, %v1018_v0  ;;  %v1020_v2 = vpop.permute.xlu0 %1019  ;;  %v1210_v0 = vadd.f32 %v3446_v25, %v3325_v6  ;;  %v1213_v53 = vadd.f32 %v3446_v25, %v3334_v39 }
 0x185   : > { %2244 = vmatmul.msk.f32.gmra.mxu1 %vm1054_vm1, %v3332_v42  ;;  %v3422_v4 = vsel %vm1037_vm0, %v764_v55, %v1020_v2 }
 0x18b   : > { %v3343_v33 = vpop.f32.mrf.mxu0 }
 0x18d   : > { %2245 = vmatmul.msk.f32.gmra.mxu1 %vm1054_vm1, %v3341_v52 }
 0x193   : > { %v3352_v9 = vpop.f32.mrf.mxu0 }
 0x195   : > { %2246 = vmatmul.msk.f32.gmra.mxu1 %vm1054_vm1, %v3350_v35 }
 0x19b   : > { %v3361_v27 = vpop.f32.mrf.mxu0 }
 0x19d   : > { %2247 = vmatmul.msk.f32.gmra.mxu1 %vm1054_vm1, %v3359_v22 }
 0x1a3   : > { %v3370_v34 = vpop.f32.mrf.mxu0 }
 0x1a5   : > { %2248 = vmatmul.msk.f32.gmra.mxu1 %vm1054_vm1, %v3368_v29 }
 0x1ab   : > { %v3385_v36 = vpop.f32.mrf.mxu0 }
 0x1ad   : > { %2249 = vmatmul.msk.f32.gmra.mxu1 %vm1054_vm1, %v3383_v8 }
 0x1b3   : > { %v3406_v50 = vpop.f32.mrf.mxu0 }
 0x1b5   : > { %2250 = vmatmul.msk.f32.gmra.mxu1 %vm1054_vm1, %v3404_v48 }
 0x1bb   : > { %v3427_v32 = vpop.f32.mrf.mxu0 }
 0x1bd   : > { %2251 = vmatmul.msk.f32.gmra.mxu1 %vm1054_vm1, %v3422_v4 }
 0x1c3   : > { %v3437_v19 = vpop.f32.mrf.mxu0 }
 0x1cb   : > { %v3439_v56 = vpop.f32.mrf.mxu0 }
 0x1d3   : > { %v3441_v45 = vpop.f32.mrf.mxu0 }
 0x1da   : > { %v1271_v41 = vpop.f32.mrf.mxu1 }
 0x1db   : > { %v1262_v47 = vpop.f32.mrf.mxu0 }
 0x1dc   : > { %v1263_v3 = vadd.f32 %v1262_v47, %v1198_v54 }
 0x1de   : > { %v1310_v28 = vmax.f32 %v1263_v3, 0.0 }
 0x1e0   : > { %2252 = vmatmul.msk.f32.vlgmr.msra.gmra.mxu0 %vm1071_vm2, %v1310_v28  ;;  %v1207_v28 = vadd.f32 %v3446_v25, %v3316_v20 }
 0x1e2   : > { %v1274_v37 = vpop.f32.mrf.mxu1  ;;  %v1272_v39 = vadd.f32 %v1271_v41, %v1207_v28 }
 0x1e3   : > { %v1275_v61 = vadd.f32 %v1274_v37, %v1210_v0  ;;  %v1265_v55 = vpop.f32.mrf.mxu0  ;;  %v1216_v0 = vadd.f32 %v3446_v25, %v3343_v33  ;;  %v1222_v33 = vadd.f32 %v3446_v25, %v3361_v27  ;;  %v1231_v27 = vadd.f32 %v3446_v25, %v3406_v50 }
 0x1e4   : > { %v1266_v57 = vadd.f32 %v1265_v55, %v1201_v43  ;;  %v1219_v55 = vadd.f32 %v3446_v25, %v3352_v9  ;;  %v1228_v9 = vadd.f32 %v3446_v25, %v3385_v36  ;;  %v1237_v36 = vadd.f32 %v3446_v25, %v3437_v19 }
 0x1e5   : > { %v1314_v2 = vmax.f32 %v1275_v61, 0.0  ;;  %v1313_v61 = vmax.f32 %v1272_v39, 0.0  ;;  %v1240_v50 = vadd.f32 %v3446_v25, %v3439_v56 }
 0x1e6   : > { %v1311_v26 = vmax.f32 %v1266_v57, 0.0 }
 0x1e7   : > { %2256 = vmatmul.msk.f32.vlgmr.msra.gmra.mxu2 %vm1071_vm2, %v1314_v2 }
 0x1e8   : > { %2253 = vmatmul.msk.f32.gmra.mxu0 %vm1071_vm2, %v1311_v26 }
 0x1ea   : > { %v1277_v6 = vpop.f32.mrf.mxu1 }
 0x1eb   : > { %v1278_v60 = vadd.f32 %v1277_v6, %v1213_v53  ;;  %v1268_v54 = vpop.f32.mrf.mxu0 }
 0x1ec   : > { %v1269_v16 = vadd.f32 %v1268_v54, %v1204_v62  ;;  %v1225_v62 = vadd.f32 %v3446_v25, %v3370_v34  ;;  %v1234_v34 = vadd.f32 %v3446_v25, %v3427_v32  ;;  %v1243_v32 = vadd.f32 %v3446_v25, %v3441_v45 }
 0x1ed   : > { %v1315_v47 = vmax.f32 %v1278_v60, 0.0 }
 0x1ee   : > { %v1312_v3 = vmax.f32 %v1269_v16, 0.0 }
 0x1ef   : > { %2257 = vmatmul.msk.f32.gmra.mxu2 %vm1071_vm2, %v1315_v47 }
 0x1f0   : > { %2254 = vmatmul.msk.f32.gmra.mxu0 %vm1071_vm2, %v1312_v3 }
 0x1f2   : > { %v1280_v43 = vpop.f32.mrf.mxu1 }
 0x1f3   : > { %v1281_v37 = vadd.f32 %v1280_v43, %v1216_v0 }
 0x1f5   : > { %v1316_v31 = vmax.f32 %v1281_v37, 0.0 }
 0x1f7   : > { %2258 = vmatmul.msk.f32.gmra.mxu2 %vm1071_vm2, %v1316_v31 }
 0x1f8   : > { %2255 = vmatmul.msk.f32.gmra.mxu0 %vm1071_vm2, %v1313_v61 }
 0x1fa   : > { %v1283_v57 = vpop.f32.mrf.mxu1 }
 0x1fb   : > { %v1284_v2 = vadd.f32 %v1283_v57, %v1219_v55 }
 0x1fd   : > { %v1317_v20 = vmax.f32 %v1284_v2, 0.0 }
 0x1ff   : > { %2259 = vmatmul.msk.f32.gmra.mxu2 %vm1071_vm2, %v1317_v20 }
 0x202   : > { %v1286_v41 = vpop.f32.mrf.mxu1 }
 0x203   : > { %v1287_v26 = vadd.f32 %v1286_v41, %v1222_v33 }
 0x205   : > { %v1318_v53 = vmax.f32 %v1287_v26, 0.0 }
 0x207   : > { %2260 = vmatmul.msk.f32.gmra.mxu2 %vm1071_vm2, %v1318_v53 }
 0x20a   : > { %v1289_v6 = vpop.f32.mrf.mxu1 }
 0x20b   : > { %v1290_v60 = vadd.f32 %v1289_v6, %v1225_v62 }
 0x20d   : > { %v1319_v54 = vmax.f32 %v1290_v60, 0.0 }
 0x20f   : > { %2261 = vmatmul.msk.f32.gmra.mxu2 %vm1071_vm2, %v1319_v54 }
 0x212   : > { %v1292_v16 = vpop.f32.mrf.mxu1 }
 0x213   : > { %v1293_v47 = vadd.f32 %v1292_v16, %v1228_v9 }
 0x215   : > { %v1320_v3 = vmax.f32 %v1293_v47, 0.0 }
 0x217   : > { %2262 = vmatmul.msk.f32.gmra.mxu2 %vm1071_vm2, %v1320_v3 }
 0x21a   : > { %v1295_v28 = vpop.f32.mrf.mxu1 }
 0x21b   : > { %v1296_v0 = vadd.f32 %v1295_v28, %v1231_v27 }
 0x21d   : > { %v1321_v39 = vmax.f32 %v1296_v0, 0.0 }
 0x21f   : > { %2263 = vmatmul.msk.f32.gmra.mxu2 %vm1071_vm2, %v1321_v39 }
 0x222   : > { %v1298_v43 = vpop.f32.mrf.mxu1 }
 0x223   : > { %v1299_v37 = vadd.f32 %v1298_v43, %v1234_v34 }
 0x225   : > { %v1322_v31 = vmax.f32 %v1299_v37, 0.0 }
 0x227   : > { %2264 = vmatmul.msk.f32.gmra.mxu2 %vm1071_vm2, %v1322_v31 }
 0x22a   : > { %v1301_v61 = vpop.f32.mrf.mxu1 }
 0x22b   : > { %v1302_v55 = vadd.f32 %v1301_v61, %v1237_v36 }
 0x22d   : > { %v1323_v57 = vmax.f32 %v1302_v55, 0.0 }
 0x22f   : > { %2265 = vmatmul.msk.f32.gmra.mxu2 %vm1071_vm2, %v1323_v57 }
 0x232   : > { %v1304_v2 = vpop.f32.mrf.mxu1 }
 0x233   : > { %v1305_v20 = vadd.f32 %v1304_v2, %v1240_v50 }
 0x235   : > { %v1324_v33 = vmax.f32 %v1305_v20, 0.0 }
 0x237   : > { %2266 = vmatmul.msk.f32.gmra.mxu2 %vm1071_vm2, %v1324_v33 }
 0x23a   : > { %v1307_v41 = vpop.f32.mrf.mxu1 }
 0x23b   : > { %v1308_v26 = vadd.f32 %v1307_v41, %v1243_v32 }
 0x23d   : > { %v1325_v53 = vmax.f32 %v1308_v26, 0.0 }
 0x23f   : > { %2267 = vmatmul.msk.f32.gmra.mxu2 %vm1071_vm2, %v1325_v53 }
 0x25d   : > { %v3496_v19 = vpop.f32.mrf.mxu0 }
 0x265   : > { %v3498_v62 = vpop.f32.mrf.mxu0 }
 0x26a   : > { %v1415_v6 = vpop.f32.mrf.mxu2 }
 0x26b   : > { %v1464_v56 = vsel %vm1451_vm3, %v1415_v6, -inf }
 0x26c   : > { %1465 = vmax.xlane.f32.xlu0 %v1464_v56 }
 0x26d   : > { %v1409_v60 = vpop.f32.mrf.mxu0 }
 0x26e   : > { %v1458_v54 = vsel %vm1451_vm3, %v1409_v60, -inf }
 0x26f   : > { %1459 = vmax.xlane.f32.xlu1 %v1458_v54 }
 0x272   : > { %v1418_v9 = vpop.f32.mrf.mxu2 }
 0x273   : > { %v1467_v3 = vsel %vm1451_vm3, %v1418_v9, -inf }
 0x275   : > { %v1412_v45 = vpop.f32.mrf.mxu0 }
 0x276   : > { %v1461_v25 = vsel %vm1451_vm3, %v1412_v45, -inf }
 0x277   : > { %1462 = vmax.xlane.f32.xlu2 %v1461_v25 }
 0x27a   : > { %v1421_v16 = vpop.f32.mrf.mxu2 }
 0x27b   : > { %v1470_v47 = vsel %vm1451_vm3, %v1421_v16, -inf }
 0x27c   : > { %1471 = vmax.xlane.f32.xlu1 %v1470_v47 }
 0x27f   : > { %1468 = vmax.xlane.f32.xlu2 %v1467_v3 }
 0x282   : > { %v1424_v27 = vpop.f32.mrf.mxu2 }
 0x283   : > { %v1473_v28 = vsel %vm1451_vm3, %v1424_v27, -inf }
 0x287   : > { %1474 = vmax.xlane.f32.xlu2 %v1473_v28 }
 0x28a   : > { %v1427_v0 = vpop.f32.mrf.mxu2 }
 0x28b   : > { %v1476_v39 = vsel %vm1451_vm3, %v1427_v0, -inf }
 0x28c   : > { %1477 = vmax.xlane.f32.xlu0 %v1476_v39 }
 0x292   : > { %v3507_v34 = vpop.f32.mrf.mxu2 }
 0x293   : > { %v1479_v43 = vsel %vm1451_vm3, %v3507_v34, -inf }
 0x294   : > { %1480 = vmax.xlane.f32.xlu2 %v1479_v43 }
 0x29a   : > { %v3511_v37 = vpop.f32.mrf.mxu2 }
 0x29b   : > { %v1482_v39 = vsel %vm1451_vm3, %v3511_v37, -inf }
 0x2a2   : > { %v3513_v50 = vpop.f32.mrf.mxu2 }
 0x2df   : > { %v1466_v31 = vpop.xlane.xlu0 %1465 }
 0x2e0   : > { %v1504_v36 = vsub.f32 %v1415_v6, %v1466_v31  ;;  %v3521_v6 = vpop.f32.mrf.mxu2 }
 0x2e2   : > { %v1524_v61 = vmul.f32 1.442695, %v1504_v36  ;;  %v1460_v55 = vpop.xlane.xlu1 %1459 }
 0x2e3   : > { %v1502_v57 = vsub.f32 %v1409_v60, %v1460_v55 }
 0x2e4   : > { %2371 = vpow2.f32 %v1524_v61 }
 0x2e5   : > { %v1520_v2 = vmul.f32 1.442695, %v1502_v57 }
 0x2e7   : > { %2373 = vpow2.f32 %v1520_v2 }
 0x2e8   : > { %v3533_v31 = vpop.f32.mrf.mxu2 }
 0x2ea   : > { %v3515_v20 = vpop.eup %2371  ;;  %v1463_v33 = vpop.xlane.xlu2 %1462 }
 0x2eb   : > { %v1503_v32 = vsub.f32 %v1412_v45, %v1463_v33  ;;  %v1560_v41 = vsel %vm1451_vm3, %v3515_v20, 0.0  ;;  %v1488_v45 = vsel %vm1451_vm3, %v3521_v6, -inf }
 0x2ec   : > { %1561 = vadd.xlane.f32.xlu2 %v1560_v41 }
 0x2ed   : > { %v3519_v26 = vpop.eup %2373  ;;  %v1522_v53 = vmul.f32 1.442695, %v1503_v32 }
 0x2ee   : > { %v1554_v56 = vsel %vm1451_vm3, %v3519_v26, 0.0 }
 0x2ef   : > { %2375 = vpow2.f32 %v1522_v53  ;;  %1555 = vadd.xlane.f32.xlu1 %v1554_v56  ;;  %v1472_v60 = vpop.xlane.xlu1 %1471 }
 0x2f0   : > { %v1506_v3 = vsub.f32 %v1421_v16, %v1472_v60  ;;  %v1485_v16 = vsel %vm1451_vm3, %v3513_v50, -inf  ;;  %v3541_v41 = vpop.f32.mrf.mxu2 }
 0x2f2   : > { %v1469_v54 = vpop.xlane.xlu2 %1468 }
 0x2f3   : > { %v1505_v25 = vsub.f32 %v1418_v9, %v1469_v54  ;;  %v1528_v9 = vmul.f32 1.442695, %v1506_v3  ;;  %v1491_v54 = vsel %vm1451_vm3, %v3533_v31, -inf }
 0x2f4   : > { %1489 = vmax.xlane.f32.xlu2 %v1488_v45 }
 0x2f5   : > { %v3527_v47 = vpop.eup %2375  ;;  %v1526_v28 = vmul.f32 1.442695, %v1505_v25 }
 0x2f6   : > { %v1557_v43 = vsel %vm1451_vm3, %v3527_v47, 0.0 }
 0x2f7   : > { %2377 = vpow2.f32 %v1526_v28  ;;  %1483 = vmax.xlane.f32.xlu1 %v1482_v39  ;;  %1558 = vadd.xlane.f32.xlu0 %v1557_v43  ;;  %v1494_v43 = vsel %vm1451_vm3, %v3541_v41, -inf }
 0x2f8   : > { %2379 = vpow2.f32 %v1528_v9  ;;  %v3556_v39 = vpop.f32.mrf.mxu2 }
 0x2fa   : > { %v1475_v36 = vpop.xlane.xlu2 %1474 }
 0x2fb   : > { %v1507_v61 = vsub.f32 %v1424_v27, %v1475_v36  ;;  %v1497_v36 = vsel %vm1451_vm3, %v3556_v39, -inf }
 0x2fd   : > { %v3535_v55 = vpop.eup %2377  ;;  %v1530_v57 = vmul.f32 1.442695, %v1507_v61 }
 0x2fe   : > { %v1563_v2 = vsel %vm1451_vm3, %v3535_v55, 0.0  ;;  %v3543_v56 = vpop.eup %2379 }
 0x2ff   : > { %2381 = vpow2.f32 %v1530_v57  ;;  %v1478_v33 = vpop.xlane.xlu0 %1477  ;;  %1486 = vmax.xlane.f32.xlu0 %v1485_v16  ;;  %1564 = vadd.xlane.f32.xlu1 %v1563_v2  ;;  %v1566_v60 = vsel %vm1451_vm3, %v3543_v56, 0.0  ;;  %v1455_v16 = vsel %vm1451_vm3, %v3498_v62, -inf  ;;  %v1628_v2 = vld [vmem:[%s3962_s5] sm:$0x3f] }
 0x300   : > { %v1508_v32 = vsub.f32 %v1427_v0, %v1478_v33  ;;  %2341 = vmatpush.msk.msra.mxu3 %vm1678_vm4, %v1628_v2  ;;  %2268 = vmatpush.msk.msrb.mxu0 %vm1678_vm4, %v1628_v2 }
 0x302   : > { %v1532_v53 = vmul.f32 1.442695, %v1508_v32 }
 0x304   : > { %2383 = vpow2.f32 %v1532_v53 }
 0x305   : > { %v3545_v27 = vpop.eup %2381 }
 0x306   : > { %v1569_v25 = vsel %vm1451_vm3, %v3545_v27, 0.0 }
 0x307   : > { %1567 = vadd.xlane.f32.xlu0 %v1566_v60  ;;  %1492 = vmax.xlane.f32.xlu1 %v1491_v54  ;;  %v1481_v0 = vpop.xlane.xlu2 %1480 }
 0x308   : > { %1570 = vadd.xlane.f32.xlu2 %v1569_v25  ;;  %v1509_v45 = vsub.f32 %v3507_v34, %v1481_v0  ;;  %v1452_v34 = vsel %vm1451_vm3, %v3496_v19, -inf }
 0x30a   : > { %v1534_v3 = vmul.f32 1.442695, %v1509_v45  ;;  %v3554_v28 = vpop.eup %2383 }
 0x30b   : > { %v1572_v9 = vsel %vm1451_vm3, %v3554_v28, 0.0 }
 0x30c   : > { %2385 = vpow2.f32 %v1534_v3 }
 0x30f   : > { %1495 = vmax.xlane.f32.xlu0 %v1494_v43  ;;  %1573 = vadd.xlane.f32.xlu1 %v1572_v9 }
 0x310   : > { %1498 = vmax.xlane.f32.xlu2 %v1497_v36 }
 0x312   : > { %v3564_v61 = vpop.eup %2385 }
 0x313   : > { %v1575_v57 = vsel %vm1451_vm3, %v3564_v61, 0.0 }
 0x317   : > { %1453 = vmax.xlane.f32.xlu1 %v1452_v34  ;;  %1576 = vadd.xlane.f32.xlu0 %v1575_v57 }
 0x31f   : > { %1456 = vmax.xlane.f32.xlu0 %v1455_v16 }
 0x35f   : > { %v1562_v33 = vpop.xlane.xlu2 %1561 }
 0x362   : > { %v1556_v32 = vpop.xlane.xlu1 %1555 }
 0x363   : > { %2387 = vrcp.f32 %v1556_v32 }
 0x367   : > { %v1490_v60 = vpop.xlane.xlu2 %1489 }
 0x368   : > { %v1512_v3 = vsub.f32 %v3521_v6, %v1490_v60 }
 0x369   : > { %v2388_v53 = vpop.eup %2387 }
 0x36a   : > { %v1484_v54 = vpop.xlane.xlu1 %1483  ;;  %v1559_v25 = vpop.xlane.xlu0 %1558  ;;  %v3578_v0 = vmul.f32 %v2388_v53, %v3519_v26  ;;  %v1540_v36 = vmul.f32 1.442695, %v1512_v3 }
 0x36b   : > { %v1510_v45 = vsub.f32 %v3511_v37, %v1484_v54  ;;  %2389 = vrcp.f32 %v1559_v25 }
 0x36c   : > { %2271 = vmatmul.msk.f32.vlgmr.msra.gmra.mxu3 %vm1451_vm3, %v3578_v0 }
 0x36d   : > { %v1536_v43 = vmul.f32 1.442695, %v1510_v45 }
 0x36f   : > { %2391 = vpow2.f32 %v1536_v43 }
 0x370   : > { %2393 = vrcp.f32 %v1562_v33 }
 0x371   : > { %v2390_v9 = vpop.eup %2389  ;;  %2395 = vpow2.f32 %v1540_v36 }
 0x372   : > { %v1487_v34 = vpop.xlane.xlu0 %1486  ;;  %v1565_v57 = vpop.xlane.xlu1 %1564  ;;  %v3585_v16 = vmul.f32 %v2390_v9, %v3527_v47 }
 0x373   : > { %v1511_v26 = vsub.f32 %v3513_v50, %v1487_v34 }
 0x374   : > { %2272 = vmatmul.msk.f32.gmra.mxu3 %vm1451_vm3, %v3585_v16 }
 0x375   : > { %v3590_v37 = vpop.eup %2391  ;;  %v1538_v2 = vmul.f32 1.442695, %v1511_v26 }
 0x376   : > { %v1578_v6 = vsel %vm1451_vm3, %v3590_v37, 0.0  ;;  %v2394_v32 = vpop.eup %2393 }
 0x377   : > { %2397 = vpow2.f32 %v1538_v2  ;;  %1579 = vadd.xlane.f32.xlu2 %v1578_v6  ;;  %v3595_v47 = vmul.f32 %v2394_v32, %v3515_v20  ;;  %v3597_v50 = vpop.eup %2395  ;;  %v1629_v2 = vld [vmem:[%s3962_s5 + $0x8] sm:$0x3f] }
 0x378   : > { %2399 = vrcp.f32 %v1565_v57  ;;  %v1584_v43 = vsel %vm1451_vm3, %v3597_v50, 0.0  ;;  %2285 = vmatpush.msk.msrb.mxu3 %vm1678_vm4, %v1629_v2 }
 0x37a   : > { %v1568_v33 = vpop.xlane.xlu0 %1567  ;;  %v1493_v53 = vpop.xlane.xlu1 %1492 }
 0x37b   : > { %v1513_v60 = vsub.f32 %v3533_v31, %v1493_v53  ;;  %v1571_v54 = vpop.xlane.xlu2 %1570 }
 0x37c   : > { %2273 = vmatmul.msk.f32.gmra.mxu3 %vm1451_vm3, %v3595_v47 }
 0x37d   : > { %v3602_v25 = vpop.eup %2397  ;;  %v1542_v45 = vmul.f32 1.442695, %v1513_v60 }
 0x37e   : > { %v1581_v3 = vsel %vm1451_vm3, %v3602_v25, 0.0  ;;  %v2400_v9 = vpop.eup %2399 }
 0x37f   : > { %2401 = vpow2.f32 %v1542_v45  ;;  %1582 = vadd.xlane.f32.xlu1 %v1581_v3  ;;  %1585 = vadd.xlane.f32.xlu2 %v1584_v43  ;;  %v3609_v36 = vmul.f32 %v2400_v9, %v3535_v55 }
 0x380   : > { %2403 = vrcp.f32 %v1568_v33 }
 0x382   : > { %v1496_v20 = vpop.xlane.xlu0 %1495  ;;  %v1574_v31 = vpop.xlane.xlu1 %1573 }
 0x383   : > { %v1514_v34 = vsub.f32 %v3541_v41, %v1496_v20  ;;  %v1499_v57 = vpop.xlane.xlu2 %1498 }
 0x384   : > { %v1515_v26 = vsub.f32 %v3556_v39, %v1499_v57  ;;  %2274 = vmatmul.msk.f32.gmra.mxu3 %vm1451_vm3, %v3609_v36 }
 0x385   : > { %v3618_v6 = vpop.eup %2401  ;;  %v1544_v32 = vmul.f32 1.442695, %v1514_v34 }
 0x386   : > { %v1546_v33 = vmul.f32 1.442695, %v1515_v26  ;;  %v1587_v55 = vsel %vm1451_vm3, %v3618_v6, 0.0  ;;  %v2404_v41 = vpop.eup %2403 }
 0x387   : > { %2405 = vpow2.f32 %v1544_v32  ;;  %1588 = vadd.xlane.f32.xlu0 %v1587_v55  ;;  %v3624_v60 = vmul.f32 %v2404_v41, %v3543_v56 }
 0x388   : > { %2407 = vpow2.f32 %v1546_v33 }
 0x389   : > { %2409 = vrcp.f32 %v1571_v54 }
 0x38a   : > { %v1454_v39 = vpop.xlane.xlu1 %1453  ;;  %v1577_v53 = vpop.xlane.xlu0 %1576 }
 0x38b   : > { %v1500_v45 = vsub.f32 %v3496_v19, %v1454_v39 }
 0x38c   : > { %2275 = vmatmul.msk.f32.gmra.mxu3 %vm1451_vm3, %v3624_v60 }
 0x38d   : > { %v2406_v3 = vpop.eup %2405  ;;  %v1516_v43 = vmul.f32 1.442695, %v1500_v45 }
 0x38e   : > { %v3629_v9 = vpop.eup %2407  ;;  %v1590_v20 = vsel %vm1451_vm3, %v2406_v3, 0.0 }
 0x38f   : > { %v2410_v34 = vpop.eup %2409  ;;  %2411 = vpow2.f32 %v1516_v43  ;;  %1591 = vadd.xlane.f32.xlu1 %v1590_v20  ;;  %v1593_v54 = vsel %vm1451_vm3, %v3629_v9, 0.0 }
 0x390   : > { %1594 = vadd.xlane.f32.xlu2 %v1593_v54  ;;  %2413 = vrcp.f32 %v1574_v31  ;;  %v3635_v19 = vmul.f32 %v2410_v34, %v3545_v27 }
 0x392   : > { %v1457_v56 = vpop.xlane.xlu0 %1456 }
 0x393   : > { %v1501_v57 = vsub.f32 %v3498_v62, %v1457_v56 }
 0x394   : > { %2276 = vmatmul.msk.f32.gmra.mxu3 %vm1451_vm3, %v3635_v19 }
 0x395   : > { %v2412_v26 = vpop.eup %2411  ;;  %v1518_v2 = vmul.f32 1.442695, %v1501_v57 }
 0x396   : > { %v1548_v32 = vsel %vm1451_vm3, %v2412_v26, 0.0  ;;  %v2414_v33 = vpop.eup %2413 }
 0x397   : > { %2415 = vpow2.f32 %v1518_v2  ;;  %1549 = vadd.xlane.f32.xlu0 %v1548_v32  ;;  %v3642_v55 = vmul.f32 %v2414_v33, %v3554_v28 }
 0x398   : > { %2417 = vrcp.f32 %v1577_v53 }
 0x39c   : > { %2277 = vmatmul.msk.f32.gmra.mxu3 %vm1451_vm3, %v3642_v55 }
 0x39d   : > { %v2416_v27 = vpop.eup %2415 }
 0x39e   : > { %v1551_v62 = vsel %vm1451_vm3, %v2416_v27, 0.0  ;;  %v2418_v31 = vpop.eup %2417 }
 0x39f   : > { %1552 = vadd.xlane.f32.xlu1 %v1551_v62  ;;  %v3648_v41 = vmul.f32 %v2418_v31, %v3564_v61 }
 0x3a4   : > { %2278 = vmatmul.msk.f32.gmra.mxu3 %vm1451_vm3, %v3648_v41 }
 0x3ea   : > { %v1580_v39 = vpop.xlane.xlu2 %1579 }
 0x3eb   : > { %2419 = vrcp.f32 %v1580_v39 }
 0x3f1   : > { %v2420_v53 = vpop.eup %2419 }
 0x3f2   : > { %v1583_v45 = vpop.xlane.xlu1 %1582  ;;  %v3653_v28 = vmul.f32 %v2420_v53, %v3590_v37  ;;  %v1586_v43 = vpop.xlane.xlu2 %1585 }
 0x3f3   : > { %2421 = vrcp.f32 %v1583_v45 }
 0x3f4   : > { %2279 = vmatmul.msk.f32.gmra.mxu3 %vm1451_vm3, %v3653_v28  ;;  %2423 = vrcp.f32 %v1586_v43 }
 0x3f9   : > { %v2422_v20 = vpop.eup %2421 }
 0x3fa   : > { %v3658_v61 = vmul.f32 %v2422_v20, %v3602_v25  ;;  %v1589_v34 = vpop.xlane.xlu0 %1588  ;;  %v2424_v54 = vpop.eup %2423  ;;  %v1860_v20 = vld [vmem:[%s3963_s6 + $0x68] sm:$0xff] }
 0x3fb   : > { %2425 = vrcp.f32 %v1589_v34  ;;  %v3663_v56 = vmul.f32 %v2424_v54, %v3597_v50  ;;  %v1869_v54 = vld [vmem:[%s3963_s6 + $0xb0] sm:$0xff] }
 0x3fc   : > { %2280 = vmatmul.msk.f32.gmra.mxu3 %vm1451_vm3, %v3658_v61 }
 0x401   : > { %v2426_v57 = vpop.eup %2425 }
 0x402   : > { %v1592_v37 = vpop.xlane.xlu1 %1591  ;;  %v3668_v32 = vmul.f32 %v2426_v57, %v3618_v6  ;;  %v1858_v57 = vld [vmem:[%s3963_s6 + $0x58] sm:$0xff] }
 0x403   : > { %2427 = vrcp.f32 %v1592_v37  ;;  %v1595_v25 = vpop.xlane.xlu2 %1594  ;;  %v1859_v37 = vld [vmem:[%s3963_s6 + $0x60] sm:$0xff] }
 0x404   : > { %2281 = vmatmul.msk.f32.gmra.mxu3 %vm1451_vm3, %v3663_v56 }
 0x409   : > { %v2428_v33 = vpop.eup %2427 }
 0x40a   : > { %v1550_v2 = vpop.xlane.xlu0 %1549  ;;  %v3672_v39 = vmul.f32 %v2428_v33, %v2406_v3  ;;  %v1862_v3 = vld [vmem:[%s3963_s6 + $0x78] sm:$0xff]  ;;  %v1856_v33 = vld [vmem:[%s3963_s6 + $0x48] sm:$0xff] }
 0x40b   : > { %2429 = vrcp.f32 %v1550_v2  ;;  %1923 = vmatpush.msrb.mxu1 %v1862_v3  ;;  %v1852_v3 = vld [vmem:[%s3963_s6 + $0x28] sm:$0xff] }
 0x40c   : > { %2282 = vmatmul.msk.f32.gmra.mxu3 %vm1451_vm3, %v3668_v32  ;;  %2431 = vrcp.f32 %v1595_v25  ;;  %v1857_v25 = vld [vmem:[%s3963_s6 + $0x50] sm:$0xff] }
 0x411   : > { %v2430_v62 = vpop.eup %2429 }
 0x412   : > { %v1612_v50 = vmul.f32 %v2430_v62, %v2412_v26  ;;  %v1553_v31 = vpop.xlane.xlu1 %1552  ;;  %v2432_v6 = vpop.eup %2431  ;;  %v1870_v26 = vld [vmem:[%s3963_s6 + $0xb8] sm:$0xff]  ;;  %v1867_v62 = vld [vmem:[%s3963_s6 + $0xa0] sm:$0xff] }
 0x413   : > { %2433 = vrcp.f32 %v1553_v31  ;;  %v3678_v43 = vmul.f32 %v2432_v6, %v3629_v9  ;;  %1996 = vmatpush.msrb.mxu2 %v1870_v26  ;;  %v1861_v9 = vld [vmem:[%s3963_s6 + $0x70] sm:$0xff]  ;;  %v1866_v31 = vld [vmem:[%s3963_s6 + $0x98] sm:$0xff] }
 0x414   : > { %2269 = vmatmul.msk.f32.vlgmr.msrb.gmra.mxu0 %vm1451_vm3, %v1612_v50  ;;  %2283 = vmatmul.msk.f32.gmra.mxu3 %vm1451_vm3, %v3672_v39 }
 0x415   : > { %1924 = vmatpush.msrb.mxu1 %v1861_v9  ;;  %1997 = vmatpush.msrb.mxu2 %v1869_v54  ;;  %v1849_v9 = vld [vmem:[%s3963_s6 + $0x10] sm:$0xff]  ;;  %v1847_v54 = vld [vmem:[%s3963_s6] sm:$0xff] }
 0x417   : > { %1925 = vmatpush.msrb.mxu1 %v1860_v20  ;;  %v1848_v20 = vld [vmem:[%s3963_s6 + $0x8] sm:$0xff] }
 0x419   : > { %v2434_v53 = vpop.eup %2433  ;;  %1926 = vmatpush.msrb.mxu1 %v1859_v37 }
 0x41a   : > { %v1613_v45 = vmul.f32 %v2434_v53, %v2416_v27  ;;  %v3690_v27 = vpop.f32.mrf.mxu3  ;;  %v1865_v53 = vld [vmem:[%s3963_s6 + $0x90] sm:$0xff] }
 0x41b   : > { %1927 = vmatpush.msrb.mxu1 %v1858_v57  ;;  %v1863_v57 = vld [vmem:[%s3963_s6 + $0x80] sm:$0xff] }
 0x41c   : > { %2270 = vmatmul.msk.f32.gmra.mxu0 %vm1451_vm3, %v1613_v45  ;;  %2284 = vmatmul.msk.f32.gmra.mxu3 %vm1451_vm3, %v3678_v43 }
 0x41d   : > { %1928 = vmatpush.msrb.mxu1 %v1857_v25 }
 0x41f   : > { %1929 = vmatpush.msrb.mxu1 %v1856_v33 }
 0x422   : > { %v3699_v34 = vpop.f32.mrf.mxu3 }
 0x424   : > { %2286 = vmatmul.msk.f32.vlgmr.msrb.gmra.mxu3 %vm1451_vm3, %v1612_v50  ;;  %v1855_v50 = vld [vmem:[%s3963_s6 + $0x40] sm:$0xff] }
 0x425   : > { %1930 = vmatpush.msrb.mxu1 %v1855_v50 }
 0x42a   : > { %v3717_v2 = vpop.f32.mrf.mxu3 }
 0x42c   : > { %2287 = vmatmul.msk.f32.gmra.mxu3 %vm1451_vm3, %v1613_v45 }
 0x434   : > { %2288 = vmatmul.msk.f32.gmra.mxu3 %vm1451_vm3, %v3578_v0  ;;  %v1868_v0 = vld [vmem:[%s3963_s6 + $0xa8] sm:$0xff] }
 0x435   : > { %1998 = vmatpush.msrb.mxu2 %v1868_v0 }
 0x437   : > { %1999 = vmatpush.msrb.mxu2 %v1867_v62 }
 0x439   : > { %2000 = vmatpush.msrb.mxu2 %v1866_v31 }
 0x43b   : > { %2001 = vmatpush.msrb.mxu2 %v1865_v53 }
 0x43c   : > { %2289 = vmatmul.msk.f32.gmra.mxu3 %vm1451_vm3, %v3585_v16  ;;  %v3724_v16 = vpop.f32.mrf.mxu3 }
 0x444   : > { %2290 = vmatmul.msk.f32.gmra.mxu3 %vm1451_vm3, %v3595_v47  ;;  %v3734_v47 = vpop.f32.mrf.mxu3 }
 0x44c   : > { %2291 = vmatmul.msk.f32.gmra.mxu3 %vm1451_vm3, %v3609_v36  ;;  %v1854_v36 = vld [vmem:[%s3963_s6 + $0x38] sm:$0xff]  ;;  %v3747_v6 = vpop.f32.mrf.mxu3 }
 0x44d   : > { %1931 = vmatpush.msrb.mxu1 %v1854_v36 }
 0x454   : > { %2292 = vmatmul.msk.f32.gmra.mxu3 %vm1451_vm3, %v3624_v60  ;;  %v1853_v60 = vld [vmem:[%s3963_s6 + $0x30] sm:$0xff]  ;;  %v3759_v45 = vpop.f32.mrf.mxu3 }
 0x455   : > { %1932 = vmatpush.msrb.mxu1 %v1853_v60 }
 0x457   : > { %1933 = vmatpush.msrb.mxu1 %v1852_v3 }
 0x45c   : > { %2293 = vmatmul.msk.f32.gmra.mxu3 %vm1451_vm3, %v3635_v19  ;;  %v1851_v19 = vld [vmem:[%s3963_s6 + $0x20] sm:$0xff]  ;;  %v3772_v26 = vpop.f32.mrf.mxu3 }
 0x45d   : > { %1934 = vmatpush.msrb.mxu1 %v1851_v19 }
 0x464   : > { %2294 = vmatmul.msk.f32.gmra.mxu3 %vm1451_vm3, %v3642_v55  ;;  %v1850_v55 = vld [vmem:[%s3963_s6 + $0x18] sm:$0xff] }
 0x465   : > { %1935 = vmatpush.msrb.mxu1 %v1850_v55 }
 0x467   : > { %1936 = vmatpush.msrb.mxu1 %v1849_v9 }
 0x469   : > { %1937 = vmatpush.msrb.mxu1 %v1848_v20 }
 0x46b   : > { %1938 = vmatpush.msrb.mxu1 %v1847_v54 }
 0x46c   : > { %2295 = vmatmul.msk.f32.gmra.mxu3 %vm1451_vm3, %v3648_v41  ;;  %v1864_v41 = vld [vmem:[%s3963_s6 + $0x88] sm:$0xff] }
 0x46d   : > { %2002 = vmatpush.msrb.mxu2 %v1864_v41 }
 0x46f   : > { %2003 = vmatpush.msrb.mxu2 %v1863_v57 }
 0x474   : > { %2296 = vmatmul.msk.f32.gmra.mxu3 %vm1451_vm3, %v3653_v28 }
 0x477   : > { %v1732_v37 = vpop.f32.mrf.mxu3 }
 0x47c   : > { %2297 = vmatmul.msk.f32.gmra.mxu3 %vm1451_vm3, %v3658_v61 }
 0x47f   : > { %v1735_v0 = vpop.f32.mrf.mxu3 }
 0x484   : > { %2298 = vmatmul.msk.f32.gmra.mxu3 %vm1451_vm3, %v3663_v56 }
 0x487   : > { %v1738_v25 = vpop.f32.mrf.mxu3 }
 0x488   : > { %v1839_v3 = vmul.f32 %v1738_v25, %v3238_v23 }
 0x48c   : > { %2299 = vmatmul.msk.f32.gmra.mxu3 %vm1451_vm3, %v3668_v32  ;;  %v1819_v32 = vmul.f32 %v3690_v27, %v3110_v24 }
 0x48f   : > { %v3797_v33 = vpop.f32.mrf.mxu3 }
 0x490   : > { %v1841_v19 = vmul.f32 %v3797_v33, %v3246_v38 }
 0x491   : > { %v1702_v28 = vpop.f32.mrf.mxu0 }
 0x492   : > { %v1815_v62 = vmul.f32 %v1702_v28, %v3077_v21 }
 0x494   : > { %2300 = vmatmul.msk.f32.gmra.mxu3 %vm1451_vm3, %v3672_v39  ;;  %1939 = vmatmul.f32.vlgmr.msrb.gmra.mxu1 %v1815_v62  ;;  %v1821_v39 = vmul.f32 %v3699_v34, %v3130_v1  ;;  %v2054_v62 = vld [vmem:[%s3876_s29 + $0x8] sm:$0xff] }
 0x497   : > { %v3802_v61 = vpop.f32.mrf.mxu3 }
 0x499   : > { %v1705_v50 = vpop.f32.mrf.mxu0 }
 0x49a   : > { %v1817_v36 = vmul.f32 %v1705_v50, %v3096_v63 }
 0x49c   : > { %2301 = vmatmul.msk.f32.gmra.mxu3 %vm1451_vm3, %v3678_v43  ;;  %1942 = vmatmul.f32.gmra.mxu1 %v1817_v36  ;;  %v1823_v43 = vmul.f32 %v3717_v2, %v3141_v18 }
 0x49f   : > { %v3807_v56 = vpop.f32.mrf.mxu3 }
 0x4a4   : > { %1945 = vmatmul.f32.gmra.mxu1 %v1819_v32 }
 0x4a7   : > { %v1767_v21 = vpop.f32.mrf.mxu3 }
 0x4a8   : > { %v1816_v31 = vmul.f32 %v1767_v21, %v3268_v7  ;;  %v1825_v7 = vmul.f32 %v3724_v16, %v3155_v17  ;;  %v2055_v21 = vld [vmem:[%s3876_s29 + $0x10] sm:$0xff] }
 0x4aa   : > { %2302 = vmatmul.msk.f32.vlgmr.msrb.gmra.mxu2 %vm1054_vm1, %v1816_v31 }
 0x4ac   : > { %1948 = vmatmul.f32.gmra.mxu1 %v1821_v39 }
 0x4af   : > { %v1770_v63 = vpop.f32.mrf.mxu3 }
 0x4b0   : > { %v1818_v60 = vmul.f32 %v1770_v63, %v3289_v49  ;;  %v1827_v49 = vmul.f32 %v3734_v47, %v3166_v59 }
 0x4b2   : > { %2303 = vmatmul.msk.f32.gmra.mxu2 %vm1054_vm1, %v1818_v60 }
 0x4b4   : > { %1951 = vmatmul.f32.gmra.mxu1 %v1823_v43  ;;  %v2056_v43 = vld [vmem:[%s3876_s29 + $0x18] sm:$0xff] }
 0x4b7   : > { %v1773_v24 = vpop.f32.mrf.mxu3 }
 0x4b8   : > { %v1820_v27 = vmul.f32 %v1773_v24, %v3305_v12  ;;  %v1829_v12 = vmul.f32 %v3747_v6, %v3180_v10 }
 0x4ba   : > { %2304 = vmatmul.msk.f32.gmra.mxu2 %vm1054_vm1, %v1820_v27 }
 0x4bc   : > { %1954 = vmatmul.f32.gmra.mxu1 %v1825_v7 }
 0x4bf   : > { %v1776_v1 = vpop.f32.mrf.mxu3 }
 0x4c0   : > { %v1822_v34 = vmul.f32 %v1776_v1, %v3273_v30  ;;  %v1831_v30 = vmul.f32 %v3759_v45, %v3191_v14  ;;  %v1837_v45 = vmul.f32 %v1735_v0, %v3227_v46 }
 0x4c2   : > { %2305 = vmatmul.msk.f32.gmra.mxu2 %vm1054_vm1, %v1822_v34 }
 0x4c4   : > { %1957 = vmatmul.f32.gmra.mxu1 %v1827_v49  ;;  %v2057_v49 = vld [vmem:[%s3876_s29 + $0x20] sm:$0xff] }
 0x4c7   : > { %v1779_v18 = vpop.f32.mrf.mxu3 }
 0x4c8   : > { %v1824_v2 = vmul.f32 %v1779_v18, %v3284_v58  ;;  %v1833_v58 = vmul.f32 %v3772_v26, %v3205_v40 }
 0x4ca   : > { %2306 = vmatmul.msk.f32.gmra.mxu2 %vm1054_vm1, %v1824_v2 }
 0x4cc   : > { %1960 = vmatmul.f32.gmra.mxu1 %v1829_v12 }
 0x4cf   : > { %v1782_v17 = vpop.f32.mrf.mxu3 }
 0x4d0   : > { %v1826_v16 = vmul.f32 %v1782_v17, %v3300_v13  ;;  %v1835_v13 = vmul.f32 %v1732_v37, %v3216_v51  ;;  %v2053_v37 = vld [vmem:[%s3876_s29] sm:$0xff] }
 0x4d2   : > { %2307 = vmatmul.msk.f32.gmra.mxu2 %vm1054_vm1, %v1826_v16 }
 0x4d4   : > { %1963 = vmatmul.f32.gmra.mxu1 %v1831_v30  ;;  %v2058_v30 = vld [vmem:[%s3876_s29 + $0x28] sm:$0xff] }
 0x4d7   : > { %v1785_v59 = vpop.f32.mrf.mxu3 }
 0x4d8   : > { %v1828_v47 = vmul.f32 %v1785_v59, %v3314_v15 }
 0x4da   : > { %2308 = vmatmul.msk.f32.gmra.mxu2 %vm1054_vm1, %v1828_v47 }
 0x4dc   : > { %1966 = vmatmul.f32.gmra.mxu1 %v1833_v58 }
 0x4df   : > { %v1788_v10 = vpop.f32.mrf.mxu3 }
 0x4e0   : > { %v1830_v6 = vmul.f32 %v1788_v10, %v3323_v5 }
 0x4e2   : > { %2309 = vmatmul.msk.f32.gmra.mxu2 %vm1054_vm1, %v1830_v6 }
 0x4e4   : > { %1969 = vmatmul.f32.gmra.mxu1 %v1835_v13  ;;  %v2059_v13 = vld [vmem:[%s3876_s29 + $0x30] sm:$0xff] }
 0x4e7   : > { %v1791_v14 = vpop.f32.mrf.mxu3 }
 0x4e8   : > { %v1832_v53 = vmul.f32 %v1791_v14, %v3332_v42 }
 0x4ea   : > { %2310 = vmatmul.msk.f32.gmra.mxu2 %vm1054_vm1, %v1832_v53 }
 0x4ec   : > { %1972 = vmatmul.f32.gmra.mxu1 %v1837_v45 }
 0x4ef   : > { %v1794_v40 = vpop.f32.mrf.mxu3 }
 0x4f0   : > { %v1834_v15 = vmul.f32 %v1794_v40, %v3341_v52  ;;  %v1843_v52 = vmul.f32 %v3802_v61, %v3254_v11 }
 0x4f2   : > { %2311 = vmatmul.msk.f32.gmra.mxu2 %vm1054_vm1, %v1834_v15 }
 0x4f4   : > { %1975 = vmatmul.f32.gmra.mxu1 %v1839_v3  ;;  %v2060_v3 = vld [vmem:[%s3876_s29 + $0x38] sm:$0xff] }
 0x4f7   : > { %v1797_v51 = vpop.f32.mrf.mxu3 }
 0x4f8   : > { %v1836_v5 = vmul.f32 %v1797_v51, %v3350_v35  ;;  %v1845_v35 = vmul.f32 %v3807_v56, %v3260_v44 }
 0x4fa   : > { %2312 = vmatmul.msk.f32.gmra.mxu2 %vm1054_vm1, %v1836_v5 }
 0x4fc   : > { %1978 = vmatmul.f32.gmra.mxu1 %v1841_v19 }
 0x4ff   : > { %v1800_v46 = vpop.f32.mrf.mxu3 }
 0x500   : > { %v1838_v42 = vmul.f32 %v1800_v46, %v3359_v22 }
 0x502   : > { %2313 = vmatmul.msk.f32.gmra.mxu2 %vm1054_vm1, %v1838_v42  ;;  %v2061_v42 = vld [vmem:[%s3876_s29 + $0x40] sm:$0xff] }
 0x504   : > { %1981 = vmatmul.f32.gmra.mxu1 %v1843_v52 }
 0x507   : > { %v1803_v23 = vpop.f32.mrf.mxu3 }
 0x508   : > { %v1840_v55 = vmul.f32 %v1803_v23, %v3368_v29 }
 0x50a   : > { %2314 = vmatmul.msk.f32.gmra.mxu2 %vm1054_vm1, %v1840_v55 }
 0x50c   : > { %1984 = vmatmul.f32.gmra.mxu1 %v1845_v35 }
 0x50f   : > { %v1806_v38 = vpop.f32.mrf.mxu3 }
 0x510   : > { %v1842_v26 = vmul.f32 %v1806_v38, %v3383_v8  ;;  %v3871_v8 = vld [vmem:[%s3964_s7] ss:$0 sm:$0xff] }
 0x511   : > { %v1940_v22 = vpop.f32.mrf.mxu1 }
 0x512   : > { %2315 = vmatmul.msk.f32.gmra.mxu2 %vm1054_vm1, %v1842_v26  ;;  %v2062_v26 = vld [vmem:[%s3876_s29 + $0x48] sm:$0xff] }
 0x517   : > { %v1809_v11 = vpop.f32.mrf.mxu3 }
 0x518   : > { %v1844_v9 = vmul.f32 %v1809_v11, %v3404_v48 }
 0x519   : > { %v1943_v20 = vpop.f32.mrf.mxu1 }
 0x51a   : > { %2316 = vmatmul.msk.f32.gmra.mxu2 %vm1054_vm1, %v1844_v9  ;;  %v1944_v33 = vadd.f32 %v3871_v8, %v1943_v20 }
 0x51f   : > { %v1812_v29 = vpop.f32.mrf.mxu3 }
 0x520   : > { %v1846_v44 = vmul.f32 %v1812_v29, %v3422_v4  ;;  %v1941_v4 = vadd.f32 %v3871_v8, %v1940_v22 }
 0x521   : > { %v1946_v41 = vpop.f32.mrf.mxu1 }
 0x522   : > { %2317 = vmatmul.msk.f32.gmra.mxu2 %vm1054_vm1, %v1846_v44  ;;  %v1947_v36 = vadd.f32 %v3871_v8, %v1946_v41  ;;  %v2063_v44 = vld [vmem:[%s3876_s29 + $0x50] sm:$0xff] }
 0x529   : > { %v1949_v48 = vpop.f32.mrf.mxu1 }
 0x52a   : > { %v1950_v63 = vadd.f32 %v3871_v8, %v1949_v48 }
 0x52d   : > { %v2005_v54 = vpop.f32.mrf.mxu2 }
 0x52e   : > { %v2006_v57 = vadd.f32 %v2005_v54, %v1941_v4 }
 0x530   : > { %v2069_v0 = vadd.f32 %v2053_v37, %v2006_v57  ;;  %v2064_v57 = vld [vmem:[%s3876_s29 + $0x58] sm:$0xff] }
 0x531   : > { %v1952_v25 = vpop.f32.mrf.mxu1 }
 0x532   : > { %2085 = vst.msk [vmem:[%s3883_s24] sm:$0xff] %vm1037_vm0, %v2069_v0  ;;  %v1953_v1 = vadd.f32 %v3871_v8, %v1952_v25 }
 0x535   : > { %v2008_v28 = vpop.f32.mrf.mxu2 }
 0x536   : > { %v2009_v61 = vadd.f32 %v2008_v28, %v1944_v33 }
 0x538   : > { %v2070_v50 = vadd.f32 %v2054_v62, %v2009_v61  ;;  %v2065_v61 = vld [vmem:[%s3876_s29 + $0x60] sm:$0xff] }
 0x539   : > { %v1955_v56 = vpop.f32.mrf.mxu1 }
 0x53a   : > { %2086 = vst.msk [vmem:[%s3883_s24 + $0x8] sm:$0xff] %vm1037_vm0, %v2070_v50  ;;  %v1956_v17 = vadd.f32 %v3871_v8, %v1955_v56 }
 0x53d   : > { %v2011_v32 = vpop.f32.mrf.mxu2 }
 0x53e   : > { %v2012_v31 = vadd.f32 %v2011_v32, %v1947_v36 }
 0x540   : > { %v2071_v39 = vadd.f32 %v2055_v21, %v2012_v31  ;;  %v2066_v21 = vld [vmem:[%s3876_s29 + $0x68] sm:$0xff] }
 0x541   : > { %v1958_v27 = vpop.f32.mrf.mxu1 }
 0x542   : > { %2087 = vst.msk [vmem:[%s3883_s24 + $0x10] sm:$0xff] %vm1037_vm0, %v2071_v39  ;;  %v1959_v10 = vadd.f32 %v3871_v8, %v1958_v27 }
 0x545   : > { %v2014_v60 = vpop.f32.mrf.mxu2 }
 0x546   : > { %v2015_v24 = vadd.f32 %v2014_v60, %v1950_v63 }
 0x548   : > { %v2072_v7 = vadd.f32 %v2056_v43, %v2015_v24  ;;  %v2067_v24 = vld [vmem:[%s3876_s29 + $0x70] sm:$0xff] }
 0x549   : > { %v1961_v12 = vpop.f32.mrf.mxu1 }
 0x54a   : > { %2088 = vst.msk [vmem:[%s3883_s24 + $0x18] sm:$0xff] %vm1037_vm0, %v2072_v7  ;;  %v1962_v45 = vadd.f32 %v3871_v8, %v1961_v12 }
 0x54d   : > { %v2017_v34 = vpop.f32.mrf.mxu2 }
 0x54e   : > { %v2018_v18 = vadd.f32 %v2017_v34, %v1953_v1 }
 0x550   : > { %v2073_v2 = vadd.f32 %v2057_v49, %v2018_v18  ;;  %v2068_v18 = vld [vmem:[%s3876_s29 + $0x78] sm:$0xff] }
 0x551   : > { %v1964_v58 = vpop.f32.mrf.mxu1 }
 0x552   : > { %2089 = vst.msk [vmem:[%s3883_s24 + $0x20] sm:$0xff] %vm1037_vm0, %v2073_v2  ;;  %v1965_v19 = vadd.f32 %v3871_v8, %v1964_v58 }
 0x555   : > { %v2020_v16 = vpop.f32.mrf.mxu2 }
 0x556   : > { %v2021_v59 = vadd.f32 %v2020_v16, %v1956_v17 }
 0x558   : > { %v2074_v47 = vadd.f32 %v2058_v30, %v2021_v59 }
 0x559   : > { %v1967_v40 = vpop.f32.mrf.mxu1 }
 0x55a   : > { %2090 = vst.msk [vmem:[%s3883_s24 + $0x28] sm:$0xff] %vm1037_vm0, %v2074_v47  ;;  %v1968_v35 = vadd.f32 %v3871_v8, %v1967_v40 }
 0x55d   : > { %v2023_v6 = vpop.f32.mrf.mxu2 }
 0x55e   : > { %v2024_v14 = vadd.f32 %v2023_v6, %v1959_v10 }
 0x560   : > { %v2075_v53 = vadd.f32 %v2059_v13, %v2024_v14 }
 0x561   : > { %v1970_v23 = vpop.f32.mrf.mxu1 }
 0x562   : > { %2091 = vst.msk [vmem:[%s3883_s24 + $0x30] sm:$0xff] %vm1037_vm0, %v2075_v53  ;;  %v1971_v20 = vadd.f32 %v3871_v8, %v1970_v23 }
 0x565   : > { %v2026_v15 = vpop.f32.mrf.mxu2 }
 0x566   : > { %v2027_v51 = vadd.f32 %v2026_v15, %v1962_v45 }
 0x568   : > { %v2076_v5 = vadd.f32 %v2060_v3, %v2027_v51 }
 0x569   : > { %v1973_v9 = vpop.f32.mrf.mxu1 }
 0x56a   : > { %2092 = vst.msk [vmem:[%s3883_s24 + $0x38] sm:$0xff] %vm1037_vm0, %v2076_v5  ;;  %v1974_v54 = vadd.f32 %v3871_v8, %v1973_v9 }
 0x56d   : > { %v2029_v46 = vpop.f32.mrf.mxu2 }
 0x56e   : > { %v2030_v52 = vadd.f32 %v2029_v46, %v1965_v19 }
 0x570   : > { %v2077_v55 = vadd.f32 %v2061_v42, %v2030_v52 }
 0x571   : > { %v1976_v4 = vpop.f32.mrf.mxu1 }
 0x572   : > { %2093 = vst.msk [vmem:[%s3883_s24 + $0x40] sm:$0xff] %vm1037_vm0, %v2077_v55  ;;  %v1977_v33 = vadd.f32 %v3871_v8, %v1976_v4 }
 0x575   : > { %v2032_v38 = vpop.f32.mrf.mxu2 }
 0x576   : > { %v2033_v22 = vadd.f32 %v2032_v38, %v1968_v35 }
 0x578   : > { %v2078_v11 = vadd.f32 %v2062_v26, %v2033_v22 }
 0x579   : > { %v1979_v28 = vpop.f32.mrf.mxu1 }
 0x57a   : > { %2094 = vst.msk [vmem:[%s3883_s24 + $0x48] sm:$0xff] %vm1037_vm0, %v2078_v11  ;;  %v1980_v56 = vadd.f32 %v3871_v8, %v1979_v28 }
 0x57d   : > { %v2035_v29 = vpop.f32.mrf.mxu2 }
 0x57e   : > { %v2036_v41 = vadd.f32 %v2035_v29, %v1971_v20 }
 0x580   : > { %v2079_v48 = vadd.f32 %v2063_v44, %v2036_v41 }
 0x581   : > { %v1982_v39 = vpop.f32.mrf.mxu1 }
 0x582   : > { %2095 = vst.msk [vmem:[%s3883_s24 + $0x50] sm:$0xff] %vm1037_vm0, %v2079_v48  ;;  %v1983_v60 = vadd.f32 %v3871_v8, %v1982_v39 }
 0x585   : > { %v2038_v37 = vpop.f32.mrf.mxu2 }
 0x586   : > { %v2039_v0 = vadd.f32 %v2038_v37, %v1974_v54 }
 0x588   : > { %v2080_v25 = vadd.f32 %v2064_v57, %v2039_v0 }
 0x589   : > { %v1985_v1 = vpop.f32.mrf.mxu1 }
 0x58a   : > { %2096 = vst.msk [vmem:[%s3883_s24 + $0x58] sm:$0xff] %vm1037_vm0, %v2080_v25  ;;  %v1986_v34 = vadd.f32 %v3871_v8, %v1985_v1 }
 0x58d   : > { %v2041_v62 = vpop.f32.mrf.mxu2 }
 0x58e   : > { %v2042_v50 = vadd.f32 %v2041_v62, %v1977_v33 }
 0x590   : > { %v2081_v36 = vadd.f32 %v2065_v61, %v2042_v50 }
 0x592   : > { %2097 = vst.msk [vmem:[%s3883_s24 + $0x60] sm:$0xff] %vm1037_vm0, %v2081_v36 }
 0x595   : > { %v2044_v32 = vpop.f32.mrf.mxu2 }
 0x596   : > { %v2045_v31 = vadd.f32 %v2044_v32, %v1980_v56 }
 0x598   : > { %v2082_v63 = vadd.f32 %v2066_v21, %v2045_v31 }
 0x59a   : > { %2098 = vst.msk [vmem:[%s3883_s24 + $0x68] sm:$0xff] %vm1037_vm0, %v2082_v63 }
 0x59d   : > { %v2047_v43 = vpop.f32.mrf.mxu2 }
 0x59e   : > { %v2048_v27 = vadd.f32 %v2047_v43, %v1983_v60 }
 0x5a0   : > { %v2083_v7 = vadd.f32 %v2067_v24, %v2048_v27 }
 0x5a2   : > { %2099 = vst.msk [vmem:[%s3883_s24 + $0x70] sm:$0xff] %vm1037_vm0, %v2083_v7 }
 0x5a5   : > { %v2050_v49 = vpop.f32.mrf.mxu2 }
 0x5a6   : > { %v2051_v2 = vadd.f32 %v2050_v49, %v1986_v34 }
 0x5a8   : > { %v2084_v12 = vadd.f32 %v2068_v18, %v2051_v2 }
 0x5aa   : > { %2100 = vst.msk [vmem:[%s3883_s24 + $0x78] sm:$0xff] %vm1037_vm0, %v2084_v12 }
 0x5ab PF: > { %p15_p9 = scmp.ge.s32.totalorder %s2524_s9, 4   ;;  %s4019_s27 = smov %s2453_s28 }
 0x5ac   : > { %s4020_s28 = smov %s2533_s12  ;;  %s4021_s29 = smov %s2524_s9 }
 0x5ad   :  { %17 = sbr.rel (!%p15_p9) target bundleno = 2 (0x2), region = 131 }

</bundles_post_ra>
